<compile_context>
chip_gen: v6e
topology: v6e:2x2x1
jax: 0.10.0
libtpu: 0.0.40
codegen_flags: <defaults>
</compile_context>

<pallas_src>
from functools import partial

import jax
import jax.numpy as jnp
from jax import lax
from jax.experimental import pallas as pl
from jax.experimental.pallas import tpu as pltpu


# ----------------------------- kernel helpers -------------------------------

def _attend_project(x_q, k_all, v_all, wq, wproj, bproj, o_ref, num_heads):
    """q-proj (scale pre-folded), per-head softmax attention, fused out-proj."""
    q = jnp.dot(x_q, wq, preferred_element_type=jnp.float32)           # (TQ, C)
    C = q.shape[-1]
    hd = C // num_heads
    out = None
    for h in range(num_heads):                                          # static unroll
        qh = q[:, h * hd:(h + 1) * hd]                                   # (TQ, hd)
        kh = k_all[:, h * hd:(h + 1) * hd]                               # (Nkv, hd)
        vh = v_all[:, h * hd:(h + 1) * hd]                               # (Nkv, hd)
        # QK^T without materializing a transpose: contract dim 1 with dim 1.
        s = lax.dot_general(qh, kh, (((1,), (1,)), ((), ())),
                            preferred_element_type=jnp.float32)          # (TQ, Nkv)
        m = jnp.max(s, axis=-1, keepdims=True)
        p = jnp.exp(s - m)
        l = jnp.sum(p, axis=-1, keepdims=True)
        oh = jnp.dot(p, vh, preferred_element_type=jnp.float32)          # (TQ, hd)
        oh = oh * pl.reciprocal(l)            # normalize the small output, not p
        # concat_h(oh) @ Wproj == sum_h oh @ Wproj[h-slab]  (no lane concat)
        contrib = jnp.dot(oh, wproj[h * hd:(h + 1) * hd, :],
                          preferred_element_type=jnp.float32)            # (TQ, C)
        out = contrib if out is None else out + contrib
    o_ref[0] = out + bproj


def _fused_attn_sr_kernel(x_ref, patch_ref, wq_ref, wsr_ref, bsr_ref, g_ref,
                          be_ref, wkv_ref, wproj_ref, bproj_ref, o_ref,
                          k_sc, v_sc, *, num_heads, eps):
    # kv path (sr conv -> LN -> kv proj) computed once per batch, cached in VMEM.
    @pl.when(pl.program_id(1) == 0)
    def _():
        # stride==kernel Conv2d realized as a patch matmul, bias, then a fused
        # single-pass LayerNorm (var = E[x^2] - mu^2).
        xs = jnp.dot(patch_ref[0], wsr_ref[...],
                     preferred_element_type=jnp.float32) + bsr_ref[...]
        mu = jnp.mean(xs, axis=-1, keepdims=True)
        var = jnp.mean(xs * xs, axis=-1, keepdims=True) - mu * mu
        y = (xs - mu) * lax.rsqrt(var + eps) * g_ref[...] + be_ref[...]
        kv = jnp.dot(y, wkv_ref[...], preferred_element_type=jnp.float32)
        C = kv.shape[-1] // 2
        k_sc[...] = kv[:, :C]
        v_sc[...] = kv[:, C:]

    _attend_project(x_ref[0], k_sc[...], v_sc[...], wq_ref[...],
                    wproj_ref[...], bproj_ref[...], o_ref, num_heads)


def _fused_attn_kernel(x_ref, xkv_ref, wq_ref, wkv_ref, wproj_ref, bproj_ref,
                       o_ref, k_sc, v_sc, *, num_heads):
    @pl.when(pl.program_id(1) == 0)
    def _():
        kv = jnp.dot(xkv_ref[0], wkv_ref[...],
                     preferred_element_type=jnp.float32)
        C = kv.shape[-1] // 2
        k_sc[...] = kv[:, :C]
        v_sc[...] = kv[:, C:]

    _attend_project(x_ref[0], k_sc[...], v_sc[...], wq_ref[...],
                    wproj_ref[...], bproj_ref[...], o_ref, num_heads)


# ------------------------------ wrapper --------------------------------------

def attention_forward(x, H, W, params, *, num_heads, sr_ratio):
    B, N, C = x.shape
    hd = C // num_heads
    scale = hd ** (-0.5)

    # Fold the softmax scale into Wq (tiny (C,C) op, done once at trace time).
    wq_scaled = params["wq"] * scale

    # Query tile: keep the (8,128) constraint happy and give the (B, n_q) grid
    # real pipelining + a parallel axis (2 TCs on v7x).
    tq = 128 if (N % 128 == 0 and N > 128) else N
    n_q = N // tq

    sem = pltpu.CompilerParams(dimension_semantics=("parallel", "arbitrary"))

    if sr_ratio > 1:
        Hs, Ws = H // sr_ratio, W // sr_ratio
        Np = Hs * Ws
        ckk = C * sr_ratio * sr_ratio
        # Non-overlapping patch extraction (addressing glue only) turns the
        # stride==kernel Conv2d into a (Np, C*k*k) @ (C*k*k, C) matmul.
        x_ = x.transpose(0, 2, 1).reshape(B, C, H, W)
        patches = x_.reshape(B, C, Hs, sr_ratio, Ws, sr_ratio)
        patches = patches.transpose(0, 2, 4, 1, 3, 5).reshape(B, Np, ckk)
        w_sr = params["w_conv"].reshape(C, ckk).T                       # (ckk, C)

        kernel = partial(_fused_attn_sr_kernel, num_heads=num_heads, eps=1e-5)
        out = pl.pallas_call(
            kernel,
            out_shape=jax.ShapeDtypeStruct((B, N, C), jnp.float32),
            grid=(B, n_q),
            in_specs=[
                pl.BlockSpec((1, tq, C), lambda b, qi: (b, qi, 0)),     # x (queries)
                pl.BlockSpec((1, Np, ckk), lambda b, qi: (b, 0, 0)),    # patches
                pl.BlockSpec((C, C), lambda b, qi: (0, 0)),             # wq*scale
                pl.BlockSpec((ckk, C), lambda b, qi: (0, 0)),           # w_sr
                pl.BlockSpec((1, C), lambda b, qi: (0, 0)),             # b_sr
                pl.BlockSpec((1, C), lambda b, qi: (0, 0)),             # ln gamma
                pl.BlockSpec((1, C), lambda b, qi: (0, 0)),             # ln beta
                pl.BlockSpec((C, 2 * C), lambda b, qi: (0, 0)),         # wkv
                pl.BlockSpec((C, C), lambda b, qi: (0, 0)),             # w_proj
                pl.BlockSpec((1, C), lambda b, qi: (0, 0)),             # b_proj
            ],
            out_specs=pl.BlockSpec((1, tq, C), lambda b, qi: (b, qi, 0)),
            scratch_shapes=[pltpu.VMEM((Np, C), jnp.float32),           # k cache
                            pltpu.VMEM((Np, C), jnp.float32)],          # v cache
            compiler_params=sem,
        )(x, patches, wq_scaled, w_sr,
          params["b_sr"].reshape(1, C),
          params["g_norm"].reshape(1, C),
          params["be_norm"].reshape(1, C),
          params["wkv"], params["w_proj"], params["b_proj"].reshape(1, C))
    else:
        kernel = partial(_fused_attn_kernel, num_heads=num_heads)
        out = pl.pallas_call(
            kernel,
            out_shape=jax.ShapeDtypeStruct((B, N, C), jnp.float32),
            grid=(B, n_q),
            in_specs=[
                pl.BlockSpec((1, tq, C), lambda b, qi: (b, qi, 0)),     # x (queries)
                pl.BlockSpec((1, N, C), lambda b, qi: (b, 0, 0)),       # x (kv src)
                pl.BlockSpec((C, C), lambda b, qi: (0, 0)),             # wq*scale
                pl.BlockSpec((C, 2 * C), lambda b, qi: (0, 0)),         # wkv
                pl.BlockSpec((C, C), lambda b, qi: (0, 0)),             # w_proj
                pl.BlockSpec((1, C), lambda b, qi: (0, 0)),             # b_proj
            ],
            out_specs=pl.BlockSpec((1, tq, C), lambda b, qi: (b, qi, 0)),
            scratch_shapes=[pltpu.VMEM((N, C), jnp.float32),
                            pltpu.VMEM((N, C), jnp.float32)],
            compiler_params=sem,
        )(x, x, wq_scaled, params["wkv"], params["w_proj"],
          params["b_proj"].reshape(1, C))
    return out


# ------------------------------ reference -----------------------------------

def reference_forward(x, H, W, p, *, num_heads, sr_ratio):
    B, N, C = x.shape
    hd = C // num_heads
    scale = hd ** (-0.5)
    q = (x @ p["wq"]).reshape(B, N, num_heads, hd).transpose(0, 2, 1, 3)
    if sr_ratio > 1:
        x_ = x.transpose(0, 2, 1).reshape(B, C, H, W)
        xc = jax.lax.conv_general_dilated(
            x_, p["w_conv"], window_strides=(sr_ratio, sr_ratio), padding="VALID",
            dimension_numbers=("NCHW", "OIHW", "NCHW"))
        xc = xc + p["b_sr"].reshape(1, C, 1, 1)
        x_ = xc.reshape(B, C, -1).transpose(0, 2, 1)
        mu = x_.mean(-1, keepdims=True)
        var = ((x_ - mu) ** 2).mean(-1, keepdims=True)
        kv_in = (x_ - mu) / jnp.sqrt(var + 1e-5) * p["g_norm"] + p["be_norm"]
    else:
        kv_in = x
    Np = kv_in.shape[1]
    kv = (kv_in @ p["wkv"]).reshape(B, Np, 2, num_heads, hd).transpose(2, 0, 3, 1, 4)
    k, v = kv[0], kv[1]
    attn = (q @ jnp.swapaxes(k, -2, -1)) * scale
    attn = jax.nn.softmax(attn, axis=-1)
    o = (attn @ v).transpose(0, 2, 1, 3).reshape(B, N, C)
    return o @ p["w_proj"] + p["b_proj"]


# --------------------------------- main --------------------------------------

if __name__ == "__main__":
    B, H, W = 2, 16, 16
    C = 32
    num_heads = 2
    sr_ratio = 2
    N = H * W

    key = jax.random.PRNGKey(0)
    ks = jax.random.split(key, 10)
    std = 0.02
    params = {
        # nn.Linear stores (out, in); we keep (in, out) so x @ w applies directly.
        "wq": jax.random.normal(ks[0], (C, C), jnp.float32) * std,
        "wkv": jax.random.normal(ks[1], (C, 2 * C), jnp.float32) * std,
        "w_proj": jax.random.normal(ks[2], (C, C), jnp.float32) * std,
        "b_proj": jax.random.normal(ks[3], (C,), jnp.float32) * std,
        # sr Conv2d: weight (O, I, kh, kw), bias (O,)
        "w_conv": jax.random.normal(ks[4], (C, C, sr_ratio, sr_ratio), jnp.float32) * std,
        "b_sr": jax.random.normal(ks[5], (C,), jnp.float32) * std,
        # LayerNorm affine
        "g_norm": jnp.ones((C,), jnp.float32)
                  + jax.random.normal(ks[6], (C,), jnp.float32) * 0.1,
        "be_norm": jax.random.normal(ks[7], (C,), jnp.float32) * 0.1,
    }

    x = jax.random.normal(ks[8], (B, N, C), jnp.float32)

    out = attention_forward(x, H, W, params, num_heads=num_heads, sr_ratio=sr_ratio)
    out = jax.block_until_ready(out)

    ref = reference_forward(x, H, W, params, num_heads=num_heads, sr_ratio=sr_ratio)
    assert out.shape == (B, N, C)
    assert jnp.allclose(out, ref, atol=1e-4, rtol=1e-4), \
        f"max abs err {jnp.max(jnp.abs(out - ref))}"

    print("KERNEL_OK")
</pallas_src>

<mosaic_0001>
module attributes {stable_mosaic.version = 11 : i64} {
  func.func @_fused_attn_sr_kernel(%arg0: i32, %arg1: i32, %arg2: memref<1x128x32xf32, #tpu.memory_space<vmem>>, %arg3: memref<1x64x128xf32, #tpu.memory_space<vmem>>, %arg4: memref<32x32xf32, #tpu.memory_space<vmem>>, %arg5: memref<128x32xf32, #tpu.memory_space<vmem>>, %arg6: memref<1x32xf32, #tpu.memory_space<vmem>>, %arg7: memref<1x32xf32, #tpu.memory_space<vmem>>, %arg8: memref<1x32xf32, #tpu.memory_space<vmem>>, %arg9: memref<32x64xf32, #tpu.memory_space<vmem>>, %arg10: memref<32x32xf32, #tpu.memory_space<vmem>>, %arg11: memref<1x32xf32, #tpu.memory_space<vmem>>, %arg12: memref<1x128x32xf32, #tpu.memory_space<vmem>>, %arg13: memref<64x32xf32, #tpu.memory_space<vmem>>, %arg14: memref<64x32xf32, #tpu.memory_space<vmem>>) attributes {dimension_semantics = [#tpu.dimension_semantics<parallel>, #tpu.dimension_semantics<arbitrary>], iteration_bounds = array<i64: 2, 2>, scalar_prefetch = 0 : i64, scratch_operands = 2 : i64, tpu.core_type = #tpu.core_type<tc>, window_params = [{transform_indices = @transform_0, window_bounds = array<i64: 1, 128, 32>}, {transform_indices = @transform_1, window_bounds = array<i64: 1, 64, 128>}, {pipeline_mode = #tpu.pipeline_mode<synchronous>, transform_indices = @transform_2, window_bounds = array<i64: 32, 32>}, {pipeline_mode = #tpu.pipeline_mode<synchronous>, transform_indices = @transform_3, window_bounds = array<i64: 128, 32>}, {pipeline_mode = #tpu.pipeline_mode<synchronous>, transform_indices = @transform_4, window_bounds = array<i64: 1, 32>}, {pipeline_mode = #tpu.pipeline_mode<synchronous>, transform_indices = @transform_5, window_bounds = array<i64: 1, 32>}, {pipeline_mode = #tpu.pipeline_mode<synchronous>, transform_indices = @transform_6, window_bounds = array<i64: 1, 32>}, {pipeline_mode = #tpu.pipeline_mode<synchronous>, transform_indices = @transform_7, window_bounds = array<i64: 32, 64>}, {pipeline_mode = #tpu.pipeline_mode<synchronous>, transform_indices = @transform_8, window_bounds = array<i64: 32, 32>}, {pipeline_mode = #tpu.pipeline_mode<synchronous>, transform_indices = @transform_9, window_bounds = array<i64: 1, 32>}, {transform_indices = @transform_10, window_bounds = array<i64: 1, 128, 32>}]} {
    %c0_i32 = arith.constant 0 : i32
    %0 = arith.cmpi eq, %arg1, %c0_i32 : i32
    %1 = arith.extui %0 : i1 to i32
    %c0_i32_0 = arith.constant 0 : i32
    %2 = arith.cmpi ne, %1, %c0_i32_0 : i32
    scf.if %2 {
      %c0_26 = arith.constant 0 : index
      %c0_27 = arith.constant 0 : index
      %c0_28 = arith.constant 0 : index
      %51 = vector.load %arg3[%c0_26, %c0_27, %c0_28] : memref<1x64x128xf32, #tpu.memory_space<vmem>>, vector<1x64x128xf32>
      %52 = vector.shape_cast %51 : vector<1x64x128xf32> to vector<64x128xf32>
      %c0_29 = arith.constant 0 : index
      %c0_30 = arith.constant 0 : index
      %53 = vector.load %arg5[%c0_29, %c0_30] : memref<128x32xf32, #tpu.memory_space<vmem>>, vector<128x32xf32>
      %cst_31 = arith.constant dense<0.000000e+00> : vector<64x32xf32>
      %54 = tpu.matmul %52, %53, %cst_31 {dimension_numbers = #tpu.dot_dimension_numbers<[1], [0], [0], [1], [0, 0, 1, 1], [], []>} : vector<64x128xf32>, vector<128x32xf32>, vector<64x32xf32> -> vector<64x32xf32>
      %c0_32 = arith.constant 0 : index
      %c0_33 = arith.constant 0 : index
      %55 = vector.load %arg6[%c0_32, %c0_33] : memref<1x32xf32, #tpu.memory_space<vmem>>, vector<1x32xf32>
      %56 = vector.broadcast %55 : vector<1x32xf32> to vector<64x32xf32>
      %57 = arith.addf %54, %56 : vector<64x32xf32>
      %cst_34 = arith.constant dense<0.000000e+00> : vector<64xf32>
      %58 = vector.multi_reduction <add>, %57, %cst_34 [1] : vector<64x32xf32> to vector<64xf32>
      %59 = vector.shape_cast %58 : vector<64xf32> to vector<64x1xf32>
      %cst_35 = arith.constant 3.200000e+01 : f32
      %60 = vector.broadcast %cst_35 : f32 to vector<64x1xf32>
      %61 = arith.divf %59, %60 : vector<64x1xf32>
      %62 = arith.mulf %57, %57 : vector<64x32xf32>
      %cst_36 = arith.constant dense<0.000000e+00> : vector<64xf32>
      %63 = vector.multi_reduction <add>, %62, %cst_36 [1] : vector<64x32xf32> to vector<64xf32>
      %64 = vector.shape_cast %63 : vector<64xf32> to vector<64x1xf32>
      %cst_37 = arith.constant 3.200000e+01 : f32
      %65 = vector.broadcast %cst_37 : f32 to vector<64x1xf32>
      %66 = arith.divf %64, %65 : vector<64x1xf32>
      %67 = arith.mulf %61, %61 : vector<64x1xf32>
      %68 = arith.subf %66, %67 : vector<64x1xf32>
      %69 = vector.broadcast %61 : vector<64x1xf32> to vector<64x32xf32>
      %70 = arith.subf %57, %69 : vector<64x32xf32>
      %cst_38 = arith.constant 9.99999974E-6 : f32
      %71 = vector.broadcast %cst_38 : f32 to vector<64x1xf32>
      %72 = arith.addf %68, %71 : vector<64x1xf32>
      %73 = math.rsqrt %72 : vector<64x1xf32>
      %74 = vector.broadcast %73 : vector<64x1xf32> to vector<64x32xf32>
      %75 = arith.mulf %70, %74 : vector<64x32xf32>
      %c0_39 = arith.constant 0 : index
      %c0_40 = arith.constant 0 : index
      %76 = vector.load %arg7[%c0_39, %c0_40] : memref<1x32xf32, #tpu.memory_space<vmem>>, vector<1x32xf32>
      %77 = vector.broadcast %76 : vector<1x32xf32> to vector<64x32xf32>
      %78 = arith.mulf %75, %77 : vector<64x32xf32>
      %c0_41 = arith.constant 0 : index
      %c0_42 = arith.constant 0 : index
      %79 = vector.load %arg8[%c0_41, %c0_42] : memref<1x32xf32, #tpu.memory_space<vmem>>, vector<1x32xf32>
      %80 = vector.broadcast %79 : vector<1x32xf32> to vector<64x32xf32>
      %81 = arith.addf %78, %80 : vector<64x32xf32>
      %c0_43 = arith.constant 0 : index
      %c0_44 = arith.constant 0 : index
      %82 = vector.load %arg9[%c0_43, %c0_44] : memref<32x64xf32, #tpu.memory_space<vmem>>, vector<32x64xf32>
      %cst_45 = arith.constant dense<0.000000e+00> : vector<64x64xf32>
      %83 = tpu.matmul %81, %82, %cst_45 {dimension_numbers = #tpu.dot_dimension_numbers<[1], [0], [0], [1], [0, 0, 1, 1], [], []>} : vector<64x32xf32>, vector<32x64xf32>, vector<64x64xf32> -> vector<64x64xf32>
      %84 = vector.extract_strided_slice %83 {offsets = [0, 0], sizes = [64, 32], strides = [1, 1]} : vector<64x64xf32> to vector<64x32xf32>
      %c0_46 = arith.constant 0 : index
      %c0_47 = arith.constant 0 : index
      %85 = vector.load %arg13[%c0_46, %c0_47] : memref<64x32xf32, #tpu.memory_space<vmem>>, vector<64x32xf32>
      tpu.vector_store %arg13[%c0_46, %c0_47], %84 {strides = array<i32>} : memref<64x32xf32, #tpu.memory_space<vmem>>, vector<64x32xf32>,
      %86 = vector.extract_strided_slice %83 {offsets = [0, 32], sizes = [64, 32], strides = [1, 1]} : vector<64x64xf32> to vector<64x32xf32>
      %c0_48 = arith.constant 0 : index
      %c0_49 = arith.constant 0 : index
      %87 = vector.load %arg14[%c0_48, %c0_49] : memref<64x32xf32, #tpu.memory_space<vmem>>, vector<64x32xf32>
      tpu.vector_store %arg14[%c0_48, %c0_49], %86 {strides = array<i32>} : memref<64x32xf32, #tpu.memory_space<vmem>>, vector<64x32xf32>,
    } else {
    }
    %c0 = arith.constant 0 : index
    %c0_1 = arith.constant 0 : index
    %c0_2 = arith.constant 0 : index
    %3 = vector.load %arg2[%c0, %c0_1, %c0_2] : memref<1x128x32xf32, #tpu.memory_space<vmem>>, vector<1x128x32xf32>
    %4 = vector.shape_cast %3 : vector<1x128x32xf32> to vector<128x32xf32>
    %c0_3 = arith.constant 0 : index
    %c0_4 = arith.constant 0 : index
    %5 = vector.load %arg13[%c0_3, %c0_4] : memref<64x32xf32, #tpu.memory_space<vmem>>, vector<64x32xf32>
    %c0_5 = arith.constant 0 : index
    %c0_6 = arith.constant 0 : index
    %6 = vector.load %arg14[%c0_5, %c0_6] : memref<64x32xf32, #tpu.memory_space<vmem>>, vector<64x32xf32>
    %c0_7 = arith.constant 0 : index
    %c0_8 = arith.constant 0 : index
    %7 = vector.load %arg4[%c0_7, %c0_8] : memref<32x32xf32, #tpu.memory_space<vmem>>, vector<32x32xf32>
    %c0_9 = arith.constant 0 : index
    %c0_10 = arith.constant 0 : index
    %8 = vector.load %arg10[%c0_9, %c0_10] : memref<32x32xf32, #tpu.memory_space<vmem>>, vector<32x32xf32>
    %c0_11 = arith.constant 0 : index
    %c0_12 = arith.constant 0 : index
    %9 = vector.load %arg11[%c0_11, %c0_12] : memref<1x32xf32, #tpu.memory_space<vmem>>, vector<1x32xf32>
    %cst = arith.constant dense<0.000000e+00> : vector<128x32xf32>
    %10 = tpu.matmul %4, %7, %cst {dimension_numbers = #tpu.dot_dimension_numbers<[1], [0], [0], [1], [0, 0, 1, 1], [], []>} : vector<128x32xf32>, vector<32x32xf32>, vector<128x32xf32> -> vector<128x32xf32>
    %11 = vector.extract_strided_slice %10 {offsets = [0, 0], sizes = [128, 16], strides = [1, 1]} : vector<128x32xf32> to vector<128x16xf32>
    %12 = vector.extract_strided_slice %5 {offsets = [0, 0], sizes = [64, 16], strides = [1, 1]} : vector<64x32xf32> to vector<64x16xf32>
    %13 = vector.extract_strided_slice %6 {offsets = [0, 0], sizes = [64, 16], strides = [1, 1]} : vector<64x32xf32> to vector<64x16xf32>
    %cst_13 = arith.constant dense<0.000000e+00> : vector<128x64xf32>
    %14 = tpu.matmul %11, %12, %cst_13 {dimension_numbers = #tpu.dot_dimension_numbers<[1], [1], [0], [0], [0, 0, 1, 0], [], []>} : vector<128x16xf32>, vector<64x16xf32>, vector<128x64xf32> -> vector<128x64xf32>
    %cst_14 = arith.constant dense<0xFF800000> : vector<128xf32>
    %15 = vector.multi_reduction <maximumf>, %14, %cst_14 [1] : vector<128x64xf32> to vector<128xf32>
    %16 = vector.shape_cast %15 : vector<128xf32> to vector<128x1xf32>
    %17 = vector.broadcast %16 : vector<128x1xf32> to vector<128x64xf32>
    %18 = arith.subf %14, %17 : vector<128x64xf32>
    %19 = math.exp %18 : vector<128x64xf32>
    %cst_15 = arith.constant dense<0.000000e+00> : vector<128xf32>
    %20 = vector.multi_reduction <add>, %19, %cst_15 [1] : vector<128x64xf32> to vector<128xf32>
    %21 = vector.shape_cast %20 : vector<128xf32> to vector<128x1xf32>
    %cst_16 = arith.constant dense<0.000000e+00> : vector<128x16xf32>
    %22 = tpu.matmul %19, %13, %cst_16 {dimension_numbers = #tpu.dot_dimension_numbers<[1], [0], [0], [1], [0, 0, 1, 1], [], []>} : vector<128x64xf32>, vector<64x16xf32>, vector<128x16xf32> -> vector<128x16xf32>
    %23 = tpu.reciprocal %21 : vector<128x1xf32> -> vector<128x1xf32>
    %24 = vector.broadcast %23 : vector<128x1xf32> to vector<128x16xf32>
    %25 = arith.mulf %22, %24 : vector<128x16xf32>
    %26 = vector.extract_strided_slice %8 {offsets = [0, 0], sizes = [16, 32], strides = [1, 1]} : vector<32x32xf32> to vector<16x32xf32>
    %cst_17 = arith.constant dense<0.000000e+00> : vector<128x32xf32>
    %27 = tpu.matmul %25, %26, %cst_17 {dimension_numbers = #tpu.dot_dimension_numbers<[1], [0], [0], [1], [0, 0, 1, 1], [], []>} : vector<128x16xf32>, vector<16x32xf32>, vector<128x32xf32> -> vector<128x32xf32>
    %28 = vector.extract_strided_slice %10 {offsets = [0, 16], sizes = [128, 16], strides = [1, 1]} : vector<128x32xf32> to vector<128x16xf32>
    %29 = vector.extract_strided_slice %5 {offsets = [0, 16], sizes = [64, 16], strides = [1, 1]} : vector<64x32xf32> to vector<64x16xf32>
    %30 = vector.extract_strided_slice %6 {offsets = [0, 16], sizes = [64, 16], strides = [1, 1]} : vector<64x32xf32> to vector<64x16xf32>
    %cst_18 = arith.constant dense<0.000000e+00> : vector<128x64xf32>
    %31 = tpu.matmul %28, %29, %cst_18 {dimension_numbers = #tpu.dot_dimension_numbers<[1], [1], [0], [0], [0, 0, 1, 0], [], []>} : vector<128x16xf32>, vector<64x16xf32>, vector<128x64xf32> -> vector<128x64xf32>
    %cst_19 = arith.constant dense<0xFF800000> : vector<128xf32>
    %32 = vector.multi_reduction <maximumf>, %31, %cst_19 [1] : vector<128x64xf32> to vector<128xf32>
    %33 = vector.shape_cast %32 : vector<128xf32> to vector<128x1xf32>
    %34 = vector.broadcast %33 : vector<128x1xf32> to vector<128x64xf32>
    %35 = arith.subf %31, %34 : vector<128x64xf32>
    %36 = math.exp %35 : vector<128x64xf32>
    %cst_20 = arith.constant dense<0.000000e+00> : vector<128xf32>
    %37 = vector.multi_reduction <add>, %36, %cst_20 [1] : vector<128x64xf32> to vector<128xf32>
    %38 = vector.shape_cast %37 : vector<128xf32> to vector<128x1xf32>
    %cst_21 = arith.constant dense<0.000000e+00> : vector<128x16xf32>
    %39 = tpu.matmul %36, %30, %cst_21 {dimension_numbers = #tpu.dot_dimension_numbers<[1], [0], [0], [1], [0, 0, 1, 1], [], []>} : vector<128x64xf32>, vector<64x16xf32>, vector<128x16xf32> -> vector<128x16xf32>
    %40 = tpu.reciprocal %38 : vector<128x1xf32> -> vector<128x1xf32>
    %41 = vector.broadcast %40 : vector<128x1xf32> to vector<128x16xf32>
    %42 = arith.mulf %39, %41 : vector<128x16xf32>
    %43 = vector.extract_strided_slice %8 {offsets = [16, 0], sizes = [16, 32], strides = [1, 1]} : vector<32x32xf32> to vector<16x32xf32>
    %cst_22 = arith.constant dense<0.000000e+00> : vector<128x32xf32>
    %44 = tpu.matmul %42, %43, %cst_22 {dimension_numbers = #tpu.dot_dimension_numbers<[1], [0], [0], [1], [0, 0, 1, 1], [], []>} : vector<128x16xf32>, vector<16x32xf32>, vector<128x32xf32> -> vector<128x32xf32>
    %45 = arith.addf %27, %44 : vector<128x32xf32>
    %46 = vector.broadcast %9 : vector<1x32xf32> to vector<128x32xf32>
    %47 = arith.addf %45, %46 : vector<128x32xf32>
    %c0_23 = arith.constant 0 : index
    %c0_24 = arith.constant 0 : index
    %c0_25 = arith.constant 0 : index
    %48 = vector.load %arg12[%c0_23, %c0_24, %c0_25] : memref<1x128x32xf32, #tpu.memory_space<vmem>>, vector<1x128x32xf32>
    %49 = vector.shape_cast %48 : vector<1x128x32xf32> to vector<128x32xf32>
    %50 = vector.shape_cast %47 : vector<128x32xf32> to vector<1x128x32xf32>
    tpu.vector_store %arg12[%c0_23, %c0_24, %c0_25], %50 {strides = array<i32>} : memref<1x128x32xf32, #tpu.memory_space<vmem>>, vector<1x128x32xf32>,
    return
  }
  func.func @transform_0(%arg0: i32, %arg1: i32) -> (i32, i32, i32) {
    %c0_i32 = arith.constant 0 : i32
    %c0_i32_0 = arith.constant 0 : i32
    return %arg0, %arg1, %c0_i32 : i32, i32, i32
  }
  func.func @transform_1(%arg0: i32, %arg1: i32) -> (i32, i32, i32) {
    %c0_i32 = arith.constant 0 : i32
    %c0_i32_0 = arith.constant 0 : i32
    %c0_i32_1 = arith.constant 0 : i32
    return %arg0, %c0_i32, %c0_i32_0 : i32, i32, i32
  }
  func.func @transform_2(%arg0: i32, %arg1: i32) -> (i32, i32) {
    %c0_i32 = arith.constant 0 : i32
    %c0_i32_0 = arith.constant 0 : i32
    %c0_i32_1 = arith.constant 0 : i32
    return %c0_i32, %c0_i32_0 : i32, i32
  }
  func.func @transform_3(%arg0: i32, %arg1: i32) -> (i32, i32) {
    %c0_i32 = arith.constant 0 : i32
    %c0_i32_0 = arith.constant 0 : i32
    %c0_i32_1 = arith.constant 0 : i32
    return %c0_i32, %c0_i32_0 : i32, i32
  }
  func.func @transform_4(%arg0: i32, %arg1: i32) -> (i32, i32) {
    %c0_i32 = arith.constant 0 : i32
    %c0_i32_0 = arith.constant 0 : i32
    %c0_i32_1 = arith.constant 0 : i32
    return %c0_i32, %c0_i32_0 : i32, i32
  }
  func.func @transform_5(%arg0: i32, %arg1: i32) -> (i32, i32) {
    %c0_i32 = arith.constant 0 : i32
    %c0_i32_0 = arith.constant 0 : i32
    %c0_i32_1 = arith.constant 0 : i32
    return %c0_i32, %c0_i32_0 : i32, i32
  }
  func.func @transform_6(%arg0: i32, %arg1: i32) -> (i32, i32) {
    %c0_i32 = arith.constant 0 : i32
    %c0_i32_0 = arith.constant 0 : i32
    %c0_i32_1 = arith.constant 0 : i32
    return %c0_i32, %c0_i32_0 : i32, i32
  }
  func.func @transform_7(%arg0: i32, %arg1: i32) -> (i32, i32) {
    %c0_i32 = arith.constant 0 : i32
    %c0_i32_0 = arith.constant 0 : i32
    %c0_i32_1 = arith.constant 0 : i32
    return %c0_i32, %c0_i32_0 : i32, i32
  }
  func.func @transform_8(%arg0: i32, %arg1: i32) -> (i32, i32) {
    %c0_i32 = arith.constant 0 : i32
    %c0_i32_0 = arith.constant 0 : i32
    %c0_i32_1 = arith.constant 0 : i32
    return %c0_i32, %c0_i32_0 : i32, i32
  }
  func.func @transform_9(%arg0: i32, %arg1: i32) -> (i32, i32) {
    %c0_i32 = arith.constant 0 : i32
    %c0_i32_0 = arith.constant 0 : i32
    %c0_i32_1 = arith.constant 0 : i32
    return %c0_i32, %c0_i32_0 : i32, i32
  }
  func.func @transform_10(%arg0: i32, %arg1: i32) -> (i32, i32, i32) {
    %c0_i32 = arith.constant 0 : i32
    %c0_i32_0 = arith.constant 0 : i32
    return %arg0, %arg1, %c0_i32 : i32, i32, i32
  }
}

</mosaic_0001>

<bundles_post_ra>
// kernel: tpu_custom_call.1
= control target key start
LH: loop header
LB: loop body
LE: loop exit
PB: predicated region body
PF: predicated region fallthrough
CT: control target
= control target key end

     0   :  { %s3839_s13 = smov 0   ;;  %s3841_s14 = smov 0   ;;  %s4625_s0 = inlined_call_operand.vmem [shape: f32[2,256,32], index: 0, kind: input, shape index: {}]   ;;  %s4626_s1 = inlined_call_operand.vmem [shape: f32[2,64,128], index: 1, kind: input, shape index: {}]   ;;  %s4627_s2 = inlined_call_operand.vmem [shape: f32[32,32], index: 2, kind: input, shape index: {}]   ;;  %s4628_s3 = inlined_call_operand.vmem [shape: f32[128,32], index: 3, kind: input, shape index: {}]   ;;  %s4629_s4 = inlined_call_operand.vmem [shape: f32[1,32], index: 4, kind: input, shape index: {}]   ;;  %s4630_s5 = inlined_call_operand.vmem [shape: f32[1,32], index: 5, kind: input, shape index: {}]   ;;  %s4631_s6 = inlined_call_operand.vmem [shape: f32[1,32], index: 6, kind: input, shape index: {}]   ;;  %s4632_s7 = inlined_call_operand.vmem [shape: f32[32,64], index: 7, kind: input, shape index: {}]   ;;  %s4633_s8 = inlined_call_operand.vmem [shape: f32[32,32], index: 8, kind: input, shape index: {}]   ;;  %s4634_s9 = inlined_call_operand.vmem [shape: f32[1,32], index: 9, kind: input, shape index: {}]   ;;  %s4635_s10 = inlined_call_operand.vmem [shape: f32[2,256,32], index: 10, kind: output, shape index: {}]  }
   0x1   :  { %s3843_s15 = smov 0   ;;  %s3845_s16 = smov 0  }
   0x2   :  { %s3847_s17 = smov 0  }
   0x3 LB: > { %s29_s18 = sadd.s32 1, %s3772_s15  ;;  %s32_s19 = sadd.s32 1, %s3776_s16  ;;  %s3780_s17 = sphi %s3847_s17, %s20_s17   ;;  %s3776_s16 = sphi %s3845_s16, %s4641_s16   ;;  %s3772_s15 = sphi %s3843_s15, %s4640_s15   ;;  %s3768_s14 = sphi %s3841_s14, %s4639_s14   ;;  %s3764_s13 = sphi %s3839_s13, %s4638_s13  }
   0x4   : > { %p30_p0 = scmp.ge.s32.totalorder %s29_s18, 2  ;;  %p2887_p1 = scmp.ge.s32.totalorder %s3780_s17, 1 }
   0x5   : > { %p343_p2 = scmp.lt.s32.totalorder %s3780_s17, 5 }
   0x6   : > { %s4643_s18 = smov (%p30_p0, %s29_s18), 0  ;;  %s4645_s19 = smov (!%p30_p0, %s32_s19), %s3776_s16 }
   0x7   : > { %p344_p3 = pnand %p2887_p1, %p343_p2  ;;  %p34_p4 = scmp.ge.s32.totalorder %s4645_s19, 2 }
   0x8   : > { %s2888_s20 = sshll.u32 (!%p344_p3), %s3764_s13, 4  ;;  %p395_p5 = scmp.lt.s32.totalorder (!%p344_p3), %s3768_s14, 1 }
   0x9   : > { %s4647_s19 = smov (%p34_p4, %s4645_s19), 0  ;;  %347 = sbr.rel (%p344_p3) target bundleno = 1905 (0x771), region = 60 }
   0xa   : > { %4636 = sst [smem:[#allocation4_spill]] %s4647_s19  ;;  %p397_p6 = scmp.lt.s32.totalorder (!%p344_p3), %s2888_s20, 31 }
   0xb   : > { %p2896_p7 = scmp.ne.s32.totalorder (!%p344_p3), %s3764_s13, 0 }
   0xe   : > { %s4649_s14 = smov (!%p395_p5, %s3768_s14), 1  ;;  %s4651_s20 = smov (!%p397_p6, %s2888_s20), 31 }
   0xf   : > { %s2889_s21 = sshll.u32 %s4649_s14, 5  ;;  %s3039_s22 = sshll.u32 %s4649_s14, 6 }
  0x10   : > { %s400_s23 = sadd.s32 %s2889_s21, %s4651_s20  ;;  %s3872_s26 = scalar_lea.vmem %s4626_s1, %s3039_s22 }
  0x11   : > { %s2890_s27 = sshll.u32 %s400_s23, 3  ;;  %422 = sbr.rel (%p2896_p7) target bundleno = 756 (0x2f4), region = 64 }
  0x12   : > { %s3877_s30 = scalar_lea.vmem %s4625_s0, %s2890_s27  ;;  %s3882_s19 = scalar_lea.vmem %s4635_s10, %s2890_s27 }
  0x13   : > { %s3782_s25 = smov (!%p2896_p7), 96  }
  0x16   : > { %v446_v0 = vld [vmem:[%s4628_s3 + $0x78] sm:$0xff]  ;;  %v445_v1 = vld [vmem:[%s4628_s3 + $0x70] sm:$0xff]  ;;  %v444_v2 = vld [vmem:[%s4628_s3 + $0x68] sm:$0xff]  ;;  %vm559_vm0 = vcmask 261120  }
  0x17   : > { %3228 = vmatprep.subr.mxu0 %v446_v0  ;;  %v443_v3 = vld [vmem:[%s4628_s3 + $0x60] sm:$0xff]  ;;  %v442_v5 = vld [vmem:[%s4628_s3 + $0x58] sm:$0xff]  ;;  %v441_v6 = vld [vmem:[%s4628_s3 + $0x50] sm:$0xff] }
  0x18   : > { %3229 = vmatpush3.msra.mxu0 %v446_v0  ;;  %v423_v4 = vld [vmem:[%s3872_s26] sm:$0xff]  ;;  %v440_v7 = vld [vmem:[%s4628_s3 + $0x48] sm:$0xff]  ;;  %v438_v9 = vld [vmem:[%s4628_s3 + $0x38] sm:$0xff] }
  0x19   : > { %3230 = vmatprep.subr.mxu0 %v445_v1  ;;  %3260 = vmatprep.mubr.f32.mxu0 %v423_v4  ;;  %v439_v8 = vld [vmem:[%s4628_s3 + $0x40] sm:$0xff]  ;;  %v437_v10 = vld [vmem:[%s4628_s3 + $0x30] sm:$0xff]  ;;  %v436_v11 = vld [vmem:[%s4628_s3 + $0x28] sm:$0xff] }
  0x1a   : > { %3231 = vmatpush3.msra.mxu0 %v445_v1  ;;  %v435_v12 = vld [vmem:[%s4628_s3 + $0x20] sm:$0xff]  ;;  %v434_v13 = vld [vmem:[%s4628_s3 + $0x18] sm:$0xff]  ;;  %v433_v14 = vld [vmem:[%s4628_s3 + $0x10] sm:$0xff] }
  0x1b   : > { %3232 = vmatprep.subr.mxu0 %v444_v2  ;;  %v432_v15 = vld [vmem:[%s4628_s3 + $0x8] sm:$0xff]  ;;  %v431_v16 = vld [vmem:[%s4628_s3] sm:$0xff]  ;;  %v425_v18 = vld [vmem:[%s3872_s26 + $0x10] sm:$0xff] }
  0x1c   : > { %3233 = vmatpush3.msra.mxu0 %v444_v2  ;;  %v424_v17 = vld [vmem:[%s3872_s26 + $0x8] sm:$0xff]  ;;  %v426_v19 = vld [vmem:[%s3872_s26 + $0x18] sm:$0xff]  ;;  %v427_v20 = vld [vmem:[%s3872_s26 + $0x20] sm:$0xff] }
  0x1d   : > { %3234 = vmatprep.subr.mxu0 %v443_v3  ;;  %v428_v21 = vld [vmem:[%s3872_s26 + $0x28] sm:$0xff]  ;;  %v429_v22 = vld [vmem:[%s3872_s26 + $0x30] sm:$0xff]  ;;  %v430_v23 = vld [vmem:[%s3872_s26 + $0x38] sm:$0xff] }
  0x1e   : > { %3235 = vmatpush3.msra.mxu0 %v443_v3  ;;  %v2897_v24 = vld [vmem:[%s4629_s4] ss:$0 sm:$0xff]  ;;  %v714_v1 = vld [vmem:[%s4632_s7 + $0x18] sm:$0xff]  ;;  %v713_v2 = vld [vmem:[%s4632_s7 + $0x10] sm:$0xff] }
  0x1f   : > { %3236 = vmatprep.subr.mxu0 %v442_v5  ;;  %3272 = vmatprep.subr.mxu1 %v714_v1  ;;  %v712_v3 = vld [vmem:[%s4632_s7 + $0x8] sm:$0xff]  ;;  %v711_v4 = vld [vmem:[%s4632_s7] sm:$0xff] }
  0x20   : > { %3237 = vmatpush3.msra.mxu0 %v442_v5  ;;  %3273 = vmatpush3.msra.mxu1 %v714_v1 }
  0x21   : > { %3238 = vmatprep.subr.mxu0 %v441_v6  ;;  %3274 = vmatprep.subr.mxu1 %v713_v2 }
  0x22   : > { %3239 = vmatpush3.msra.mxu0 %v441_v6  ;;  %3275 = vmatpush3.msra.mxu1 %v713_v2 }
  0x23   : > { %3240 = vmatprep.subr.mxu0 %v440_v7  ;;  %3276 = vmatprep.subr.mxu1 %v712_v3 }
  0x24   : > { %3241 = vmatpush3.msra.mxu0 %v440_v7  ;;  %3277 = vmatpush3.msra.mxu1 %v712_v3 }
  0x25   : > { %3242 = vmatprep.subr.mxu0 %v439_v8  ;;  %3278 = vmatprep.subr.mxu1 %v711_v4 }
  0x26   : > { %3243 = vmatpush3.msra.mxu0 %v439_v8  ;;  %3279 = vmatpush3.msra.mxu1 %v711_v4 }
  0x27   : > { %3244 = vmatprep.subr.mxu0 %v438_v9 }
  0x28   : > { %3245 = vmatpush3.msra.mxu0 %v438_v9 }
  0x29   : > { %3246 = vmatprep.subr.mxu0 %v437_v10 }
  0x2a   : > { %3247 = vmatpush3.msra.mxu0 %v437_v10 }
  0x2b   : > { %3248 = vmatprep.subr.mxu0 %v436_v11 }
  0x2c   : > { %3249 = vmatpush3.msra.mxu0 %v436_v11 }
  0x2d   : > { %3250 = vmatprep.subr.mxu0 %v435_v12 }
  0x2e   : > { %3251 = vmatpush3.msra.mxu0 %v435_v12 }
  0x2f   : > { %3252 = vmatprep.subr.mxu0 %v434_v13 }
  0x30   : > { %3253 = vmatpush3.msra.mxu0 %v434_v13 }
  0x31   : > { %3254 = vmatprep.subr.mxu0 %v433_v14 }
  0x32   : > { %3255 = vmatpush3.msra.mxu0 %v433_v14 }
  0x33   : > { %3256 = vmatprep.subr.mxu0 %v432_v15 }
  0x34   : > { %3257 = vmatpush3.msra.mxu0 %v432_v15 }
  0x35   : > { %3258 = vmatprep.subr.mxu0 %v431_v16 }
  0x36   : > { %3259 = vmatpush3.msra.mxu0 %v431_v16 }
  0x37   : > { %3261 = vmatmul.mubr.f32.vlgmr.msra.gmra.mxu0 %v424_v17 }
  0x38   : > { %3263 = vmatprep.mubr.f32.mxu0 %v425_v18 }
  0x3b   : > { %3264 = vmatmul.mubr.f32.gmra.mxu0 %v426_v19 }
  0x3c   : > { %3266 = vmatprep.mubr.f32.mxu0 %v427_v20 }
  0x3f   : > { %3267 = vmatmul.mubr.f32.gmra.mxu0 %v428_v21 }
  0x40   : > { %3269 = vmatprep.mubr.f32.mxu0 %v429_v22 }
  0x43   : > { %3270 = vmatmul.mubr.f32.gmra.mxu0 %v430_v23 }
  0xf7   : > { %v3262_v25 = vpop.f32.mrf.mxu0 }
  0xf8   : > { %v3943_v26 = vadd.f32 %v3262_v25, %v2897_v24 }
  0xf9   : > { %v520_v27 = vpop.f32.mrf.mxu0 }
  0xfa   : > { %v3945_v28 = vadd.f32 %v2897_v24, %v520_v27  ;;  %v563_v29 = vsel %vm559_vm0, %v3943_v26, 0.0  ;;  %v594_v30 = vmul.f32 %v3943_v26, %v3943_v26 }
  0xfb   : > { %564 = vadd.xlane.f32.xlu0 %v563_v29  ;;  %v3265_v31 = vpop.f32.mrf.mxu0 }
  0xfc   : > { %v604_v32 = vsel %vm559_vm0, %v594_v30, 0.0  ;;  %v593_v33 = vmul.f32 %v3945_v28, %v3945_v28  ;;  %v560_v36 = vsel %vm559_vm0, %v3945_v28, 0.0  ;;  %v3958_v38 = vadd.f32 %v3265_v31, %v2897_v24 }
  0xfd   : > { %605 = vadd.xlane.f32.xlu1 %v604_v32  ;;  %v530_v34 = vpop.f32.mrf.mxu0 }
  0xfe   : > { %v3954_v35 = vadd.f32 %v2897_v24, %v530_v34  ;;  %v601_v39 = vsel %vm559_vm0, %v593_v33, 0.0  ;;  %v569_v43 = vsel %vm559_vm0, %v3958_v38, 0.0  ;;  %v596_v45 = vmul.f32 %v3958_v38, %v3958_v38 }
  0xff   : > { %561 = vadd.xlane.f32.xlu0 %v560_v36  ;;  %v3268_v37 = vpop.f32.mrf.mxu0 }
 0x100   : > { %v566_v40 = vsel %vm559_vm0, %v3954_v35, 0.0  ;;  %v595_v42 = vmul.f32 %v3954_v35, %v3954_v35  ;;  %v3972_v48 = vadd.f32 %v3268_v37, %v2897_v24  ;;  %v610_v49 = vsel %vm559_vm0, %v596_v45, 0.0 }
 0x101   : > { %602 = vadd.xlane.f32.xlu1 %v601_v39  ;;  %v540_v41 = vpop.f32.mrf.mxu0 }
 0x102   : > { %v3967_v44 = vadd.f32 %v2897_v24, %v540_v41  ;;  %v607_v47 = vsel %vm559_vm0, %v595_v42, 0.0  ;;  %v575_v53 = vsel %vm559_vm0, %v3972_v48, 0.0  ;;  %v598_v55 = vmul.f32 %v3972_v48, %v3972_v48 }
 0x103   : > { %567 = vadd.xlane.f32.xlu0 %v566_v40  ;;  %v3271_v46 = vpop.f32.mrf.mxu0 }
 0x104   : > { %v572_v50 = vsel %vm559_vm0, %v3967_v44, 0.0  ;;  %v597_v52 = vmul.f32 %v3967_v44, %v3967_v44  ;;  %v3986_v57 = vadd.f32 %v3271_v46, %v2897_v24  ;;  %v616_v58 = vsel %vm559_vm0, %v598_v55, 0.0 }
 0x105   : > { %570 = vadd.xlane.f32.xlu1 %v569_v43  ;;  %v550_v51 = vpop.f32.mrf.mxu0 }
 0x106   : > { %v3981_v54 = vadd.f32 %v2897_v24, %v550_v51  ;;  %v613_v56 = vsel %vm559_vm0, %v597_v52, 0.0  ;;  %v581_v61 = vsel %vm559_vm0, %v3986_v57, 0.0  ;;  %v600_v62 = vmul.f32 %v3986_v57, %v3986_v57 }
 0x107   : > { %608 = vadd.xlane.f32.xlu0 %v607_v47 }
 0x108   : > { %v578_v59 = vsel %vm559_vm0, %v3981_v54, 0.0  ;;  %v599_v60 = vmul.f32 %v3981_v54, %v3981_v54  ;;  %v622_v0 = vsel %vm559_vm0, %v600_v62, 0.0  ;;  %v2898_v62 = vld [vmem:[%s4630_s5] ss:$0 sm:$0xff] }
 0x109   : > { %611 = vadd.xlane.f32.xlu1 %v610_v49 }
 0x10a   : > { %v619_v63 = vsel %vm559_vm0, %v599_v60, 0.0 }
 0x10b   : > { %573 = vadd.xlane.f32.xlu0 %v572_v50 }
 0x10d   : > { %576 = vadd.xlane.f32.xlu1 %v575_v53 }
 0x10f   : > { %614 = vadd.xlane.f32.xlu0 %v613_v56 }
 0x111   : > { %617 = vadd.xlane.f32.xlu1 %v616_v58 }
 0x113   : > { %579 = vadd.xlane.f32.xlu0 %v578_v59 }
 0x115   : > { %582 = vadd.xlane.f32.xlu1 %v581_v61 }
 0x117   : > { %620 = vadd.xlane.f32.xlu0 %v619_v63 }
 0x119   : > { %623 = vadd.xlane.f32.xlu1 %v622_v0 }
 0x184   : > { %v565_v5 = vpop.xlane.xlu0 %564 }
 0x185   : > { %v586_v6 = vmul.f32 0.03125, %v565_v5 }
 0x186   : > { %v606_v7 = vpop.xlane.xlu1 %605 }
 0x187   : > { %v634_v8 = vmul.f32 %v586_v6, %v586_v6  ;;  %v626_v9 = vmul.f32 0.03125, %v606_v7  ;;  %v650_v47 = vsub.f32 %v3943_v26, %v586_v6 }
 0x188   : > { %v562_v10 = vpop.xlane.xlu0 %561 }
 0x189   : > { %v642_v11 = vsub.f32 %v626_v9, %v634_v8  ;;  %v585_v12 = vmul.f32 0.03125, %v562_v10 }
 0x18a   : > { %v603_v13 = vpop.xlane.xlu1 %602 }
 0x18b   : > { %v658_v14 = vadd.f32 1e-05, %v642_v11  ;;  %v633_v15 = vmul.f32 %v585_v12, %v585_v12  ;;  %v625_v16 = vmul.f32 0.03125, %v603_v13  ;;  %v649_v60 = vsub.f32 %v3945_v28, %v585_v12  ;;  %v2899_v28 = vld [vmem:[%s4631_s6] ss:$0 sm:$0xff] }
 0x18c   : > { %v568_v17 = vpop.xlane.xlu0 %567 }
 0x18d   : > { %3598 = vrsqrt.f32 %v658_v14  ;;  %v641_v18 = vsub.f32 %v625_v16, %v633_v15  ;;  %v587_v19 = vmul.f32 0.03125, %v568_v17 }
 0x18e   : > { %v571_v20 = vpop.xlane.xlu1 %570 }
 0x18f   : > { %v657_v21 = vadd.f32 1e-05, %v641_v18  ;;  %v4011_v22 = vmul.f32 0.03125, %v571_v20  ;;  %v635_v24 = vmul.f32 %v587_v19, %v587_v19  ;;  %v651_v7 = vsub.f32 %v3954_v35, %v587_v19 }
 0x190   : > { %v609_v23 = vpop.xlane.xlu0 %608 }
 0x191   : > { %3600 = vrsqrt.f32 %v657_v21  ;;  %v627_v25 = vmul.f32 0.03125, %v609_v23  ;;  %v636_v29 = vmul.f32 %v4011_v22, %v4011_v22  ;;  %v652_v12 = vsub.f32 %v3958_v38, %v4011_v22 }
 0x192   : > { %v612_v27 = vpop.xlane.xlu1 %611 }
 0x193   : > { %v643_v30 = vsub.f32 %v627_v25, %v635_v24  ;;  %v628_v31 = vmul.f32 0.03125, %v612_v27 }
 0x194   : > { %v574_v32 = vpop.xlane.xlu0 %573 }
 0x195   : > { %v659_v33 = vadd.f32 1e-05, %v643_v30  ;;  %v644_v34 = vsub.f32 %v628_v31, %v636_v29  ;;  %v4015_v36 = vmul.f32 0.03125, %v574_v32 }
 0x196   : > { %v577_v37 = vpop.xlane.xlu1 %576 }
 0x197   : > { %3602 = vrsqrt.f32 %v659_v33  ;;  %v660_v39 = vadd.f32 1e-05, %v644_v34  ;;  %v4017_v40 = vmul.f32 0.03125, %v577_v37  ;;  %v637_v42 = vmul.f32 %v4015_v36, %v4015_v36 }
 0x198   : > { %v615_v41 = vpop.xlane.xlu0 %614  ;;  %v653_v38 = vsub.f32 %v3967_v44, %v4015_v36 }
 0x199   : > { %3604 = vrsqrt.f32 %v660_v39  ;;  %v629_v43 = vmul.f32 0.03125, %v615_v41  ;;  %v638_v49 = vmul.f32 %v4017_v40, %v4017_v40  ;;  %v654_v25 = vsub.f32 %v3972_v48, %v4017_v40 }
 0x19a   : > { %v3599_v45 = vpop.eup %3598  ;;  %v618_v46 = vpop.xlane.xlu1 %617 }
 0x19b   : > { %v645_v50 = vsub.f32 %v629_v43, %v637_v42  ;;  %v630_v51 = vmul.f32 0.03125, %v618_v46  ;;  %v674_v58 = vmul.f32 %v3599_v45, %v650_v47 }
 0x19c   : > { %v580_v52 = vpop.xlane.xlu0 %579 }
 0x19d   : > { %v661_v53 = vadd.f32 1e-05, %v645_v50  ;;  %v646_v55 = vsub.f32 %v630_v51, %v638_v49  ;;  %v591_v56 = vmul.f32 0.03125, %v580_v52  ;;  %v689_v4 = vmul.f32 %v2898_v62, %v674_v58 }
 0x19e   : > { %v3601_v59 = vpop.eup %3600  ;;  %v583_v61 = vpop.xlane.xlu1 %582 }
 0x19f   : > { %3606 = vrsqrt.f32 %v661_v53  ;;  %v662_v26 = vadd.f32 1e-05, %v646_v55  ;;  %v592_v63 = vmul.f32 0.03125, %v583_v61  ;;  %v673_v1 = vmul.f32 %v3601_v59, %v649_v60 }
 0x1a0   : > { %v621_v0 = vpop.xlane.xlu0 %620  ;;  %v639_v2 = vmul.f32 %v591_v56, %v591_v56  ;;  %v704_v16 = vadd.f32 %v2899_v28, %v689_v4  ;;  %v655_v34 = vsub.f32 %v3981_v54, %v591_v56 }
 0x1a1   : > { %3608 = vrsqrt.f32 %v662_v26  ;;  %v631_v3 = vmul.f32 0.03125, %v621_v0  ;;  %v688_v6 = vmul.f32 %v2898_v62, %v673_v1  ;;  %v640_v8 = vmul.f32 %v592_v63, %v592_v63 }
 0x1a2   : > { %v624_v5 = vpop.xlane.xlu1 %623  ;;  %v656_v37 = vsub.f32 %v3986_v57, %v592_v63 }
 0x1a3   : > { %v647_v9 = vsub.f32 %v631_v3, %v639_v2  ;;  %v632_v10 = vmul.f32 0.03125, %v624_v5  ;;  %v703_v13 = vadd.f32 %v2899_v28, %v688_v6 }
 0x1a4   : > { %v3603_v11 = vpop.eup %3602 }
 0x1a5   : > { %v663_v14 = vadd.f32 1e-05, %v647_v9  ;;  %v648_v15 = vsub.f32 %v632_v10, %v640_v8  ;;  %v675_v17 = vmul.f32 %v3603_v11, %v651_v7  ;;  %3280 = vmatprep.mubr.msk.f32.mxu1 %vm559_vm0, %v703_v13 }
 0x1a6   : > { %v3605_v18 = vpop.eup %3604  ;;  %3281 = vmatmul.mubr.msk.f32.vlgmr.msra.gmra.mxu1 %vm559_vm0, %v704_v16 }
 0x1a7   : > { %3610 = vrsqrt.f32 %v663_v14  ;;  %v664_v20 = vadd.f32 1e-05, %v648_v15  ;;  %v690_v35 = vmul.f32 %v2898_v62, %v675_v17  ;;  %v676_v19 = vmul.f32 %v3605_v18, %v652_v12 }
 0x1a9   : > { %3612 = vrsqrt.f32 %v664_v20  ;;  %v705_v21 = vadd.f32 %v2899_v28, %v690_v35  ;;  %v691_v23 = vmul.f32 %v2898_v62, %v676_v19 }
 0x1ab   : > { %3283 = vmatprep.mubr.msk.f32.mxu1 %vm559_vm0, %v705_v21  ;;  %v706_v22 = vadd.f32 %v2899_v28, %v691_v23 }
 0x1ac   : > { %v3607_v24 = vpop.eup %3606 }
 0x1ad   : > { %3284 = vmatmul.mubr.msk.f32.gmra.mxu1 %vm559_vm0, %v706_v22  ;;  %v677_v27 = vmul.f32 %v3607_v24, %v653_v38 }
 0x1ae   : > { %v3609_v29 = vpop.eup %3608 }
 0x1af   : > { %v692_v30 = vmul.f32 %v2898_v62, %v677_v27  ;;  %v678_v31 = vmul.f32 %v3609_v29, %v654_v25 }
 0x1b1   : > { %v707_v32 = vadd.f32 %v2899_v28, %v692_v30  ;;  %v693_v33 = vmul.f32 %v2898_v62, %v678_v31 }
 0x1b3   : > { %3286 = vmatprep.mubr.msk.f32.mxu1 %vm559_vm0, %v707_v32  ;;  %v708_v44 = vadd.f32 %v2899_v28, %v693_v33 }
 0x1b4   : > { %v3611_v36 = vpop.eup %3610 }
 0x1b5   : > { %3287 = vmatmul.mubr.msk.f32.gmra.mxu1 %vm559_vm0, %v708_v44  ;;  %v679_v39 = vmul.f32 %v3611_v36, %v655_v34 }
 0x1b6   : > { %v3613_v48 = vpop.eup %3612 }
 0x1b7   : > { %v694_v40 = vmul.f32 %v2898_v62, %v679_v39  ;;  %v680_v41 = vmul.f32 %v3613_v48, %v656_v37 }
 0x1b9   : > { %v709_v42 = vadd.f32 %v2899_v28, %v694_v40  ;;  %v695_v43 = vmul.f32 %v2898_v62, %v680_v41 }
 0x1bb   : > { %3289 = vmatprep.mubr.msk.f32.mxu1 %vm559_vm0, %v709_v42  ;;  %v710_v45 = vadd.f32 %v2899_v28, %v695_v43 }
 0x1bd   : > { %3290 = vmatmul.mubr.msk.f32.gmra.mxu1 %vm559_vm0, %v710_v45 }
 0x266   : > { %v3282_v54 = vpop.f32.mrf.mxu1 }
 0x267   : > { %845 = vst.msk [vmem:[#allocation2 + $0x8] sm:$0xff] %vm559_vm0, %v3282_v54  ;;  %862 = vrot.lane.b32.xlu1 %v3282_v54, %s3782_s25 }
 0x268   : > { %v805_v46 = vpop.f32.mrf.mxu1 }
 0x269   : > { %844 = vst.msk [vmem:[#allocation2] sm:$0xff] %vm559_vm0, %v805_v46  ;;  %860 = vrot.lane.b32.xlu0 %v805_v46, %s3782_s25 }
 0x26d   : > { %v3285_v57 = vpop.f32.mrf.mxu1 }
 0x26e   : > { %847 = vst.msk [vmem:[#allocation2 + $0x18] sm:$0xff] %vm559_vm0, %v3285_v57  ;;  %866 = vrot.lane.b32.xlu1 %v3285_v57, %s3782_s25 }
 0x26f   : > { %v815_v47 = vpop.f32.mrf.mxu1 }
 0x270   : > { %846 = vst.msk [vmem:[#allocation2 + $0x10] sm:$0xff] %vm559_vm0, %v815_v47 }
 0x272   : > { %864 = vrot.lane.b32.xlu1 %v815_v47, %s3782_s25 }
 0x275   : > { %v3288_v49 = vpop.f32.mrf.mxu1 }
 0x276   : > { %849 = vst.msk [vmem:[#allocation2 + $0x28] sm:$0xff] %vm559_vm0, %v3288_v49  ;;  %870 = vrot.lane.b32.xlu1 %v3288_v49, %s3782_s25 }
 0x277   : > { %v825_v50 = vpop.f32.mrf.mxu1 }
 0x278   : > { %848 = vst.msk [vmem:[#allocation2 + $0x20] sm:$0xff] %vm559_vm0, %v825_v50  ;;  %868 = vrot.lane.b32.xlu0 %v825_v50, %s3782_s25 }
 0x27d   : > { %v3291_v51 = vpop.f32.mrf.mxu1 }
 0x27e   : > { %851 = vst.msk [vmem:[#allocation2 + $0x38] sm:$0xff] %vm559_vm0, %v3291_v51  ;;  %874 = vrot.lane.b32.xlu1 %v3291_v51, %s3782_s25 }
 0x27f   : > { %v835_v52 = vpop.f32.mrf.mxu1 }
 0x280   : > { %850 = vst.msk [vmem:[#allocation2 + $0x30] sm:$0xff] %vm559_vm0, %v835_v52  ;;  %872 = vrot.lane.b32.xlu0 %v835_v52, %s3782_s25 }
 0x2d9   : > { %v863_v53 = vpop.permute.xlu1 %862 }
 0x2da   : > { %885 = vst.msk [vmem:[#allocation3 + $0x8] sm:$0xff] %vm559_vm0, %v863_v53 }
 0x2db   : > { %v861_v55 = vpop.permute.xlu0 %860 }
 0x2dc   : > { %884 = vst.msk [vmem:[#allocation3] sm:$0xff] %vm559_vm0, %v861_v55 }
 0x2e0   : > { %v867_v56 = vpop.permute.xlu1 %866 }
 0x2e1   : > { %887 = vst.msk [vmem:[#allocation3 + $0x18] sm:$0xff] %vm559_vm0, %v867_v56 }
 0x2e4   : > { %v865_v58 = vpop.permute.xlu1 %864 }
 0x2e5   : > { %886 = vst.msk [vmem:[#allocation3 + $0x10] sm:$0xff] %vm559_vm0, %v865_v58 }
 0x2e8   : > { %v871_v59 = vpop.permute.xlu1 %870 }
 0x2e9   : > { %889 = vst.msk [vmem:[#allocation3 + $0x28] sm:$0xff] %vm559_vm0, %v871_v59 }
 0x2ea   : > { %v869_v60 = vpop.permute.xlu0 %868 }
 0x2eb   : > { %888 = vst.msk [vmem:[#allocation3 + $0x20] sm:$0xff] %vm559_vm0, %v869_v60 }
 0x2f0   : > { %v875_v61 = vpop.permute.xlu1 %874 }
 0x2f1   : > { %891 = vst.msk [vmem:[#allocation3 + $0x38] sm:$0xff] %vm559_vm0, %v875_v61 }
 0x2f2   : > { %v873_v62 = vpop.permute.xlu0 %872 }
 0x2f3   : > { %890 = vst.msk [vmem:[#allocation3 + $0x30] sm:$0xff] %vm559_vm0, %v873_v62 }
 0x2f4 PF: > { %v927_v26 = vld [vmem:[%s4627_s2 + $0x18] sm:$0xff]  ;;  %v926_v63 = vld [vmem:[%s4627_s2 + $0x10] sm:$0xff]  ;;  %vm933_vm1 = vcmask 261120   ;;  %v892_v0 = vld [vmem:[%s3877_s30] sm:$0xff]  ;;  %vm1127_vm2 = vcmask 130048   ;;  %s3783_s20 = smov 112  }
 0x2f5   : > { %3292 = vmatprep.subr.mxu0 %v927_v26  ;;  %v925_v1 = vld [vmem:[%s4627_s2 + $0x8] sm:$0xff]  ;;  %3300 = vmatprep.mubr.msk.f32.mxu0 %vm933_vm1, %v892_v0  ;;  %v924_v2 = vld [vmem:[%s4627_s2] sm:$0xff]  ;;  %v915_v4 = vld [vmem:[#allocation2 + $0x38] sm:$0xff]  ;;  %vm1345_vm3 = vcmask 523264  }
 0x2f6   : > { %3293 = vmatpush3.msra.mxu0 %v927_v26  ;;  %v893_v3 = vld [vmem:[%s3877_s30 + $0x8] sm:$0xff]  ;;  %v894_v5 = vld [vmem:[%s3877_s30 + $0x10] sm:$0xff]  ;;  %1761 = vrot.lane.b32.xlu0 %v915_v4, %s3783_s20  ;;  %v895_v7 = vld [vmem:[%s3877_s30 + $0x18] sm:$0xff] }
 0x2f7   : > { %3294 = vmatprep.subr.mxu0 %v926_v63  ;;  %v914_v6 = vld [vmem:[#allocation2 + $0x30] sm:$0xff]  ;;  %3324 = vmatprep.subr.msk.mxu1 %vm1127_vm2, %v915_v4  ;;  %v913_v28 = vld [vmem:[#allocation2 + $0x28] sm:$0xff]  ;;  %v896_v8 = vld [vmem:[%s3877_s30 + $0x20] sm:$0xff] }
 0x2f8   : > { %3295 = vmatpush3.msra.mxu0 %v926_v63  ;;  %3325 = vmatpush3.xpose.msk.msra.mxu1 %vm1127_vm2, %v915_v4  ;;  %v912_v9 = vld [vmem:[#allocation2 + $0x20] sm:$0xff]  ;;  %v911_v10 = vld [vmem:[#allocation2 + $0x18] sm:$0xff]  ;;  %v897_v11 = vld [vmem:[%s3877_s30 + $0x28] sm:$0xff] }
 0x2f9   : > { %3296 = vmatprep.subr.mxu0 %v925_v1  ;;  %3326 = vmatprep.subr.msk.mxu1 %vm1127_vm2, %v914_v6  ;;  %v898_v12 = vld [vmem:[%s3877_s30 + $0x30] sm:$0xff]  ;;  %v909_v14 = vld [vmem:[#allocation2 + $0x8] sm:$0xff]  ;;  %v899_v15 = vld [vmem:[%s3877_s30 + $0x38] sm:$0xff] }
 0x2fa   : > { %3297 = vmatpush3.msra.mxu0 %v925_v1  ;;  %1759 = vrot.lane.b32.xlu0 %v914_v6, %s3783_s20  ;;  %v910_v13 = vld [vmem:[#allocation2 + $0x10] sm:$0xff]  ;;  %v900_v16 = vld [vmem:[%s3877_s30 + $0x40] sm:$0xff]  ;;  %v901_v18 = vld [vmem:[%s3877_s30 + $0x48] sm:$0xff] }
 0x2fb   : > { %3298 = vmatprep.subr.mxu0 %v924_v2  ;;  %1757 = vrot.lane.b32.xlu1 %v913_v28, %s3783_s20  ;;  %v908_v17 = vld [vmem:[#allocation2] sm:$0xff]  ;;  %v902_v20 = vld [vmem:[%s3877_s30 + $0x50] sm:$0xff]  ;;  %v903_v35 = vld [vmem:[%s3877_s30 + $0x58] sm:$0xff] }
 0x2fc   : > { %3299 = vmatpush3.msra.mxu0 %v924_v2  ;;  %3327 = vmatpush3.xpose.msk.msra.mxu1 %vm1127_vm2, %v914_v6  ;;  %v904_v19 = vld [vmem:[%s3877_s30 + $0x60] sm:$0xff]  ;;  %v905_v21 = vld [vmem:[%s3877_s30 + $0x68] sm:$0xff]  ;;  %v906_v23 = vld [vmem:[%s3877_s30 + $0x70] sm:$0xff] }
 0x2fd   : > { %3301 = vmatmul.mubr.msk.f32.vlgmr.msra.gmra.mxu0 %vm933_vm1, %v893_v3  ;;  %3328 = vmatprep.subr.msk.mxu1 %vm1127_vm2, %v913_v28  ;;  %v907_v38 = vld [vmem:[%s3877_s30 + $0x78] sm:$0xff]  ;;  %v922_v54 = vld [vmem:[#allocation3 + $0x30] sm:$0xff]  ;;  %v921_v47 = vld [vmem:[#allocation3 + $0x28] sm:$0xff] }
 0x2fe   : > { %3303 = vmatprep.mubr.msk.f32.mxu0 %vm933_vm1, %v894_v5  ;;  %1753 = vrot.lane.b32.xlu0 %v911_v10, %s3783_s20  ;;  %v923_v41 = vld [vmem:[#allocation3 + $0x38] sm:$0xff]  ;;  %v920_v52 = vld [vmem:[#allocation3 + $0x20] sm:$0xff]  ;;  %v918_v55 = vld [vmem:[#allocation3 + $0x10] sm:$0xff] }
 0x2ff   : > { %1755 = vrot.lane.b32.xlu1 %v912_v9, %s3783_s20  ;;  %3364 = vmatprep.subr.mxu0 %v923_v41  ;;  %v919_v53 = vld [vmem:[#allocation3 + $0x18] sm:$0xff] }
 0x300   : > { %3329 = vmatpush3.xpose.msk.msra.mxu1 %vm1127_vm2, %v913_v28  ;;  %3365 = vmatpush3.msra.mxu0 %v923_v41 }
 0x301   : > { %3304 = vmatmul.mubr.msk.f32.gmra.mxu0 %vm933_vm1, %v895_v7  ;;  %3330 = vmatprep.subr.msk.mxu1 %vm1127_vm2, %v912_v9 }
 0x302   : > { %3306 = vmatprep.mubr.msk.f32.mxu0 %vm933_vm1, %v896_v8  ;;  %1749 = vrot.lane.b32.xlu0 %v909_v14, %s3783_s20 }
 0x303   : > { %1751 = vrot.lane.b32.xlu1 %v910_v13, %s3783_s20  ;;  %3366 = vmatprep.subr.mxu0 %v922_v54 }
 0x304   : > { %3331 = vmatpush3.xpose.msk.msra.mxu1 %vm1127_vm2, %v912_v9  ;;  %3367 = vmatpush3.msra.mxu0 %v922_v54 }
 0x305   : > { %3307 = vmatmul.mubr.msk.f32.gmra.mxu0 %vm933_vm1, %v897_v11  ;;  %3332 = vmatprep.subr.msk.mxu1 %vm1127_vm2, %v911_v10 }
 0x306   : > { %3309 = vmatprep.mubr.msk.f32.mxu0 %vm933_vm1, %v898_v12  ;;  %3368 = vmatprep.subr.mxu0 %v921_v47 }
 0x307   : > { %1747 = vrot.lane.b32.xlu1 %v908_v17, %s3783_s20  ;;  %3369 = vmatpush3.msra.mxu0 %v921_v47 }
 0x308   : > { %3333 = vmatpush3.xpose.msk.msra.mxu1 %vm1127_vm2, %v911_v10  ;;  %3370 = vmatprep.subr.mxu0 %v920_v52 }
 0x309   : > { %3310 = vmatmul.mubr.msk.f32.gmra.mxu0 %vm933_vm1, %v899_v15  ;;  %3334 = vmatprep.subr.msk.mxu1 %vm1127_vm2, %v910_v13 }
 0x30a   : > { %3312 = vmatprep.mubr.msk.f32.mxu0 %vm933_vm1, %v900_v16  ;;  %3371 = vmatpush3.msra.mxu0 %v920_v52 }
 0x30b   : > { %3372 = vmatprep.subr.mxu0 %v919_v53 }
 0x30c   : > { %3335 = vmatpush3.xpose.msk.msra.mxu1 %vm1127_vm2, %v910_v13  ;;  %3373 = vmatpush3.msra.mxu0 %v919_v53 }
 0x30d   : > { %3313 = vmatmul.mubr.msk.f32.gmra.mxu0 %vm933_vm1, %v901_v18  ;;  %3336 = vmatprep.subr.msk.mxu1 %vm1127_vm2, %v909_v14 }
 0x30e   : > { %3315 = vmatprep.mubr.msk.f32.mxu0 %vm933_vm1, %v902_v20  ;;  %3374 = vmatprep.subr.mxu0 %v918_v55 }
 0x30f   : > { %3375 = vmatpush3.msra.mxu0 %v918_v55 }
 0x310   : > { %3337 = vmatpush3.xpose.msk.msra.mxu1 %vm1127_vm2, %v909_v14 }
 0x311   : > { %3316 = vmatmul.mubr.msk.f32.gmra.mxu0 %vm933_vm1, %v903_v35  ;;  %3338 = vmatprep.subr.msk.mxu1 %vm1127_vm2, %v908_v17 }
 0x312   : > { %3318 = vmatprep.mubr.msk.f32.mxu0 %vm933_vm1, %v904_v19 }
 0x314   : > { %3339 = vmatpush3.xpose.msk.msra.mxu1 %vm1127_vm2, %v908_v17 }
 0x315   : > { %3319 = vmatmul.mubr.msk.f32.gmra.mxu0 %vm933_vm1, %v905_v21 }
 0x316   : > { %3321 = vmatprep.mubr.msk.f32.mxu0 %vm933_vm1, %v906_v23 }
 0x319   : > { %3322 = vmatmul.mubr.msk.f32.gmra.mxu0 %vm933_vm1, %v907_v38 }
 0x368   : > { %v1762_v22 = vpop.permute.xlu0 %1761 }
 0x369   : > { %3404 = vmatprep.subr.msk.mxu1 %vm1127_vm2, %v1762_v22 }
 0x36c   : > { %v1760_v27 = vpop.permute.xlu0 %1759 }
 0x36d   : > { %v1758_v30 = vpop.permute.xlu1 %1757 }
 0x370   : > { %v1754_v37 = vpop.permute.xlu0 %1753 }
 0x371   : > { %v1756_v34 = vpop.permute.xlu1 %1755 }
 0x374   : > { %v1750_v45 = vpop.permute.xlu0 %1749 }
 0x375   : > { %v1752_v40 = vpop.permute.xlu1 %1751 }
 0x379   : > { %v1748_v50 = vpop.permute.xlu1 %1747 }
 0x3bd   : > { %v3302_v24 = vpop.f32.mrf.mxu0 }
 0x3be   : > { %1717 = vrot.lane.b32.xlu1 %v3302_v24, %s3783_s20 }
 0x3bf   : > { %v1048_v25 = vpop.f32.mrf.mxu0 }
 0x3c0   : > { %1715 = vrot.lane.b32.xlu0 %v1048_v25, %s3783_s20  ;;  %3340 = vmatprep.mubr.msk.f32.mxu1 %vm1127_vm2, %v1048_v25 }
 0x3c1   : > { %v3305_v29 = vpop.f32.mrf.mxu0  ;;  %3341 = vmatmul.mubr.msk.f32.vlgmr.msra.gmra.mxu1 %vm1127_vm2, %v3302_v24 }
 0x3c2   : > { %1721 = vrot.lane.b32.xlu1 %v3305_v29, %s3783_s20  ;;  %3405 = vmatpush3.xpose.msk.msra.mxu1 %vm1127_vm2, %v1762_v22 }
 0x3c3   : > { %v1058_v31 = vpop.f32.mrf.mxu0  ;;  %3406 = vmatprep.subr.msk.mxu1 %vm1127_vm2, %v1760_v27 }
 0x3c4   : > { %1719 = vrot.lane.b32.xlu0 %v1058_v31, %s3783_s20  ;;  %3343 = vmatprep.mubr.msk.f32.mxu1 %vm1127_vm2, %v1058_v31 }
 0x3c5   : > { %v3308_v32 = vpop.f32.mrf.mxu0  ;;  %3344 = vmatmul.mubr.msk.f32.gmra.mxu1 %vm1127_vm2, %v3305_v29 }
 0x3c6   : > { %1725 = vrot.lane.b32.xlu1 %v3308_v32, %s3783_s20  ;;  %3407 = vmatpush3.xpose.msk.msra.mxu1 %vm1127_vm2, %v1760_v27 }
 0x3c7   : > { %v1068_v33 = vpop.f32.mrf.mxu0  ;;  %3408 = vmatprep.subr.msk.mxu1 %vm1127_vm2, %v1758_v30 }
 0x3c8   : > { %1723 = vrot.lane.b32.xlu0 %v1068_v33, %s3783_s20  ;;  %3346 = vmatprep.mubr.msk.f32.mxu1 %vm1127_vm2, %v1068_v33 }
 0x3c9   : > { %v3311_v44 = vpop.f32.mrf.mxu0  ;;  %3347 = vmatmul.mubr.msk.f32.gmra.mxu1 %vm1127_vm2, %v3308_v32 }
 0x3ca   : > { %1729 = vrot.lane.b32.xlu1 %v3311_v44, %s3783_s20  ;;  %3409 = vmatpush3.xpose.msk.msra.mxu1 %vm1127_vm2, %v1758_v30 }
 0x3cb   : > { %v1078_v36 = vpop.f32.mrf.mxu0  ;;  %3410 = vmatprep.subr.msk.mxu1 %vm1127_vm2, %v1756_v34 }
 0x3cc   : > { %1727 = vrot.lane.b32.xlu0 %v1078_v36, %s3783_s20  ;;  %3349 = vmatprep.mubr.msk.f32.mxu1 %vm1127_vm2, %v1078_v36 }
 0x3cd   : > { %v3314_v39 = vpop.f32.mrf.mxu0  ;;  %3350 = vmatmul.mubr.msk.f32.gmra.mxu1 %vm1127_vm2, %v3311_v44 }
 0x3ce   : > { %1733 = vrot.lane.b32.xlu1 %v3314_v39, %s3783_s20  ;;  %3411 = vmatpush3.xpose.msk.msra.mxu1 %vm1127_vm2, %v1756_v34 }
 0x3cf   : > { %v1088_v48 = vpop.f32.mrf.mxu0  ;;  %3412 = vmatprep.subr.msk.mxu1 %vm1127_vm2, %v1754_v37 }
 0x3d0   : > { %1731 = vrot.lane.b32.xlu0 %v1088_v48, %s3783_s20  ;;  %3352 = vmatprep.mubr.msk.f32.mxu1 %vm1127_vm2, %v1088_v48 }
 0x3d1   : > { %v3317_v42 = vpop.f32.mrf.mxu0  ;;  %3353 = vmatmul.mubr.msk.f32.gmra.mxu1 %vm1127_vm2, %v3314_v39 }
 0x3d2   : > { %1737 = vrot.lane.b32.xlu1 %v3317_v42, %s3783_s20  ;;  %3413 = vmatpush3.xpose.msk.msra.mxu1 %vm1127_vm2, %v1754_v37 }
 0x3d3   : > { %v1098_v43 = vpop.f32.mrf.mxu0  ;;  %3414 = vmatprep.subr.msk.mxu1 %vm1127_vm2, %v1752_v40 }
 0x3d4   : > { %1735 = vrot.lane.b32.xlu0 %v1098_v43, %s3783_s20  ;;  %3355 = vmatprep.mubr.msk.f32.mxu1 %vm1127_vm2, %v1098_v43 }
 0x3d5   : > { %v3320_v46 = vpop.f32.mrf.mxu0  ;;  %3356 = vmatmul.mubr.msk.f32.gmra.mxu1 %vm1127_vm2, %v3317_v42 }
 0x3d6   : > { %1741 = vrot.lane.b32.xlu1 %v3320_v46, %s3783_s20  ;;  %3415 = vmatpush3.xpose.msk.msra.mxu1 %vm1127_vm2, %v1752_v40 }
 0x3d7   : > { %v1108_v57 = vpop.f32.mrf.mxu0  ;;  %3416 = vmatprep.subr.msk.mxu1 %vm1127_vm2, %v1750_v45 }
 0x3d8   : > { %1739 = vrot.lane.b32.xlu0 %v1108_v57, %s3783_s20  ;;  %3358 = vmatprep.mubr.msk.f32.mxu1 %vm1127_vm2, %v1108_v57 }
 0x3d9   : > { %v3323_v49 = vpop.f32.mrf.mxu0  ;;  %3359 = vmatmul.mubr.msk.f32.gmra.mxu1 %vm1127_vm2, %v3320_v46 }
 0x3da   : > { %1745 = vrot.lane.b32.xlu1 %v3323_v49, %s3783_s20  ;;  %3417 = vmatpush3.xpose.msk.msra.mxu1 %vm1127_vm2, %v1750_v45  ;;  %v4290_v45 = vld [vmem:[#allocation3] sm:$0xff] }
 0x3db   : > { %v1118_v51 = vpop.f32.mrf.mxu0  ;;  %3418 = vmatprep.subr.msk.mxu1 %vm1127_vm2, %v1748_v50 }
 0x3dc   : > { %1743 = vrot.lane.b32.xlu0 %v1118_v51, %s3783_s20  ;;  %3361 = vmatprep.mubr.msk.f32.mxu1 %vm1127_vm2, %v1118_v51 }
 0x3dd   : > { %3362 = vmatmul.mubr.msk.f32.gmra.mxu1 %vm1127_vm2, %v3323_v49 }
 0x3de   : > { %3419 = vmatpush3.xpose.msk.msra.mxu1 %vm1127_vm2, %v1748_v50  ;;  %2122 = vrot.lane.b32.xlu1 %v923_v41, %s3783_s20  ;;  %v4282_v41 = vld [vmem:[#allocation3 + $0x8] sm:$0xff] }
 0x3df   : > { %3376 = vmatprep.subr.mxu0 %v4282_v41 }
 0x3e0   : > { %2120 = vrot.lane.b32.xlu0 %v922_v54, %s3783_s20  ;;  %3377 = vmatpush3.msra.mxu0 %v4282_v41 }
 0x3e1   : > { %3378 = vmatprep.subr.mxu0 %v4290_v45 }
 0x3e2   : > { %2118 = vrot.lane.b32.xlu1 %v921_v47, %s3783_s20  ;;  %3379 = vmatpush3.msra.mxu0 %v4290_v45 }
 0x3e4   : > { %2114 = vrot.lane.b32.xlu0 %v919_v53, %s3783_s20 }
 0x3e6   : > { %2116 = vrot.lane.b32.xlu1 %v920_v52, %s3783_s20 }
 0x3ea   : > { %2112 = vrot.lane.b32.xlu1 %v918_v55, %s3783_s20 }
 0x430   : > { %v1718_v56 = vpop.permute.xlu1 %1717 }
 0x432   : > { %v1716_v58 = vpop.permute.xlu0 %1715 }
 0x433   : > { %3420 = vmatprep.mubr.msk.f32.mxu1 %vm1127_vm2, %v1716_v58 }
 0x434   : > { %v1722_v59 = vpop.permute.xlu1 %1721  ;;  %3421 = vmatmul.mubr.msk.f32.vlgmr.msra.gmra.mxu1 %vm1127_vm2, %v1718_v56 }
 0x436   : > { %v1720_v60 = vpop.permute.xlu0 %1719 }
 0x437   : > { %3423 = vmatprep.mubr.msk.f32.mxu1 %vm1127_vm2, %v1720_v60 }
 0x438   : > { %v1726_v61 = vpop.permute.xlu1 %1725  ;;  %3424 = vmatmul.mubr.msk.f32.gmra.mxu1 %vm1127_vm2, %v1722_v59 }
 0x43a   : > { %v1724_v62 = vpop.permute.xlu0 %1723 }
 0x43b   : > { %3426 = vmatprep.mubr.msk.f32.mxu1 %vm1127_vm2, %v1724_v62 }
 0x43c   : > { %v1730_v26 = vpop.permute.xlu1 %1729  ;;  %3427 = vmatmul.mubr.msk.f32.gmra.mxu1 %vm1127_vm2, %v1726_v61 }
 0x43e   : > { %v1728_v63 = vpop.permute.xlu0 %1727 }
 0x43f   : > { %3429 = vmatprep.mubr.msk.f32.mxu1 %vm1127_vm2, %v1728_v63 }
 0x440   : > { %v1734_v0 = vpop.permute.xlu1 %1733  ;;  %3430 = vmatmul.mubr.msk.f32.gmra.mxu1 %vm1127_vm2, %v1730_v26 }
 0x442   : > { %v1732_v1 = vpop.permute.xlu0 %1731 }
 0x443   : > { %3432 = vmatprep.mubr.msk.f32.mxu1 %vm1127_vm2, %v1732_v1 }
 0x444   : > { %3433 = vmatmul.mubr.msk.f32.gmra.mxu1 %vm1127_vm2, %v1734_v0  ;;  %v1738_v2 = vpop.permute.xlu1 %1737 }
 0x446   : > { %v1736_v3 = vpop.permute.xlu0 %1735 }
 0x447   : > { %3435 = vmatprep.mubr.msk.f32.mxu1 %vm1127_vm2, %v1736_v3 }
 0x448   : > { %3436 = vmatmul.mubr.msk.f32.gmra.mxu1 %vm1127_vm2, %v1738_v2  ;;  %v1742_v4 = vpop.permute.xlu1 %1741 }
 0x44a   : > { %v1740_v5 = vpop.permute.xlu0 %1739 }
 0x44b   : > { %3438 = vmatprep.mubr.msk.f32.mxu1 %vm1127_vm2, %v1740_v5 }
 0x44c   : > { %3439 = vmatmul.mubr.msk.f32.gmra.mxu1 %vm1127_vm2, %v1742_v4  ;;  %v1746_v6 = vpop.permute.xlu1 %1745 }
 0x44e   : > { %v1744_v28 = vpop.permute.xlu0 %1743 }
 0x44f   : > { %3441 = vmatprep.mubr.msk.f32.mxu1 %vm1127_vm2, %v1744_v28 }
 0x450   : > { %3442 = vmatmul.mubr.msk.f32.gmra.mxu1 %vm1127_vm2, %v1746_v6  ;;  %v4202_v7 = vpop.permute.xlu1 %2122 }
 0x451   : > { %3540 = vmatprep.subr.mxu1 %v4202_v7  ;;  %3444 = vmatprep.subr.mxu0 %v4202_v7 }
 0x452   : > { %3548 = vmatpush3.msra.mxu1 %v4202_v7  ;;  %v4216_v13 = vpop.permute.xlu0 %2120 }
 0x453   : > { %3541 = vmatprep.subr.mxu1 %v4216_v13 }
 0x454   : > { %v4208_v9 = vpop.permute.xlu1 %2118  ;;  %3549 = vmatpush3.msra.mxu1 %v4216_v13 }
 0x455   : > { %3542 = vmatprep.subr.mxu1 %v4208_v9 }
 0x456   : > { %3550 = vmatpush3.msra.mxu1 %v4208_v9  ;;  %v4233_v20 = vpop.permute.xlu0 %2114 }
 0x458   : > { %v4224_v16 = vpop.permute.xlu1 %2116 }
 0x459   : > { %3543 = vmatprep.subr.mxu1 %v4224_v16 }
 0x45a   : > { %3551 = vmatpush3.msra.mxu1 %v4224_v16 }
 0x45b   : > { %3544 = vmatprep.subr.mxu1 %v4233_v20 }
 0x45c   : > { %3552 = vmatpush3.msra.mxu1 %v4233_v20  ;;  %v4246_v38 = vpop.permute.xlu1 %2112 }
 0x45d   : > { %3545 = vmatprep.subr.mxu1 %v4246_v38 }
 0x45e   : > { %3553 = vmatpush3.msra.mxu1 %v4246_v38 }
 0x481   : > { %v4206_v8 = vpop.f32.mrf.mxu1 }
 0x482   : > { %v1349_v10 = vsel %vm1345_vm3, %v4206_v8, -inf }
 0x483   : > { %v4212_v11 = vpop.f32.mrf.mxu1  ;;  %1350 = vmax.xlane.f32.xlu1 %v1349_v10 }
 0x484   : > { %v1346_v12 = vsel %vm1345_vm3, %v4212_v11, -inf }
 0x485   : > { %v4218_v14 = vpop.f32.mrf.mxu1  ;;  %1347 = vmax.xlane.f32.xlu0 %v1346_v12 }
 0x486   : > { %v1355_v17 = vsel %vm1345_vm3, %v4218_v14, -inf }
 0x487   : > { %v4222_v15 = vpop.f32.mrf.mxu1 }
 0x488   : > { %v1352_v21 = vsel %vm1345_vm3, %v4222_v15, -inf }
 0x489   : > { %v4230_v18 = vpop.f32.mrf.mxu1  ;;  %1356 = vmax.xlane.f32.xlu0 %v1355_v17 }
 0x48a   : > { %v1361_v25 = vsel %vm1345_vm3, %v4230_v18, -inf }
 0x48b   : > { %v4236_v35 = vpop.f32.mrf.mxu1 }
 0x48c   : > { %v1358_v19 = vsel %vm1345_vm3, %v4236_v35, -inf }
 0x48d   : > { %v4244_v23 = vpop.f32.mrf.mxu1  ;;  %1359 = vmax.xlane.f32.xlu1 %v1358_v19  ;;  %1353 = vmax.xlane.f32.xlu0 %v1352_v21 }
 0x48e   : > { %v1367_v31 = vsel %vm1345_vm3, %v4244_v23, -inf }
 0x48f   : > { %v4249_v22 = vpop.f32.mrf.mxu1 }
 0x490   : > { %v1364_v24 = vsel %vm1345_vm3, %v4249_v22, -inf }
 0x491   : > { %v4256_v27 = vpop.f32.mrf.mxu1  ;;  %1365 = vmax.xlane.f32.xlu1 %v1364_v24  ;;  %1362 = vmax.xlane.f32.xlu0 %v1361_v25 }
 0x492   : > { %v1373_v44 = vsel %vm1345_vm3, %v4256_v27, -inf }
 0x493   : > { %v4258_v29 = vpop.f32.mrf.mxu1 }
 0x494   : > { %v1370_v30 = vsel %vm1345_vm3, %v4258_v29, -inf }
 0x495   : > { %v4264_v32 = vpop.f32.mrf.mxu1  ;;  %1371 = vmax.xlane.f32.xlu1 %v1370_v30  ;;  %1368 = vmax.xlane.f32.xlu0 %v1367_v31 }
 0x496   : > { %v1379_v37 = vsel %vm1345_vm3, %v4264_v32, -inf }
 0x497   : > { %v4266_v33 = vpop.f32.mrf.mxu1 }
 0x498   : > { %v1376_v34 = vsel %vm1345_vm3, %v4266_v33, -inf }
 0x499   : > { %v4272_v36 = vpop.f32.mrf.mxu1  ;;  %1377 = vmax.xlane.f32.xlu1 %v1376_v34  ;;  %1374 = vmax.xlane.f32.xlu0 %v1373_v44 }
 0x49a   : > { %v1385_v42 = vsel %vm1345_vm3, %v4272_v36, -inf }
 0x49b   : > { %v4276_v39 = vpop.f32.mrf.mxu1 }
 0x49c   : > { %v1382_v48 = vsel %vm1345_vm3, %v4276_v39, -inf }
 0x49d   : > { %1383 = vmax.xlane.f32.xlu1 %v1382_v48  ;;  %1380 = vmax.xlane.f32.xlu0 %v1379_v37  ;;  %v4280_v40 = vpop.f32.mrf.mxu1 }
 0x49e   : > { %v1391_v46 = vsel %vm1345_vm3, %v4280_v40, -inf }
 0x49f   : > { %v4287_v43 = vpop.f32.mrf.mxu1 }
 0x4a0   : > { %v1388_v54 = vsel %vm1345_vm3, %v4287_v43, -inf }
 0x4a1   : > { %1386 = vmax.xlane.f32.xlu0 %v1385_v42  ;;  %1389 = vmax.xlane.f32.xlu1 %v1388_v54 }
 0x4a5   : > { %1392 = vmax.xlane.f32.xlu0 %v1391_v46 }
 0x4f4   : > { %v4299_v57 = vpop.f32.mrf.mxu1 }
 0x4f5   : > { %v1959_v47 = vsel %vm1345_vm3, %v4299_v57, -inf }
 0x4f6   : > { %1960 = vmax.xlane.f32.xlu0 %v1959_v47  ;;  %v4303_v49 = vpop.f32.mrf.mxu1 }
 0x4f7   : > { %v1956_v50 = vsel %vm1345_vm3, %v4303_v49, -inf }
 0x4f8   : > { %v4307_v51 = vpop.f32.mrf.mxu1  ;;  %1957 = vmax.xlane.f32.xlu1 %v1956_v50 }
 0x4f9   : > { %v1965_v52 = vsel %vm1345_vm3, %v4307_v51, -inf }
 0x4fa   : > { %1966 = vmax.xlane.f32.xlu0 %v1965_v52  ;;  %v4311_v53 = vpop.f32.mrf.mxu1 }
 0x4fb   : > { %v1962_v55 = vsel %vm1345_vm3, %v4311_v53, -inf }
 0x4fc   : > { %v4315_v56 = vpop.f32.mrf.mxu1  ;;  %1963 = vmax.xlane.f32.xlu1 %v1962_v55 }
 0x4fd   : > { %v1971_v58 = vsel %vm1345_vm3, %v4315_v56, -inf }
 0x4fe   : > { %1972 = vmax.xlane.f32.xlu0 %v1971_v58  ;;  %v4319_v59 = vpop.f32.mrf.mxu1 }
 0x4ff   : > { %v1968_v60 = vsel %vm1345_vm3, %v4319_v59, -inf }
 0x500   : > { %v4323_v61 = vpop.f32.mrf.mxu1  ;;  %1969 = vmax.xlane.f32.xlu1 %v1968_v60 }
 0x501   : > { %v1977_v62 = vsel %vm1345_vm3, %v4323_v61, -inf }
 0x502   : > { %1978 = vmax.xlane.f32.xlu0 %v1977_v62  ;;  %v4327_v26 = vpop.f32.mrf.mxu1 }
 0x503   : > { %v1974_v63 = vsel %vm1345_vm3, %v4327_v26, -inf }
 0x504   : > { %v4331_v0 = vpop.f32.mrf.mxu1  ;;  %1975 = vmax.xlane.f32.xlu1 %v1974_v63 }
 0x505   : > { %v1983_v1 = vsel %vm1345_vm3, %v4331_v0, -inf }
 0x506   : > { %1984 = vmax.xlane.f32.xlu0 %v1983_v1  ;;  %v4335_v2 = vpop.f32.mrf.mxu1 }
 0x507   : > { %v1980_v4 = vsel %vm1345_vm3, %v4335_v2, -inf }
 0x508   : > { %v4337_v3 = vpop.f32.mrf.mxu1 }
 0x50a   : > { %1981 = vmax.xlane.f32.xlu0 %v1980_v4  ;;  %v4341_v5 = vpop.f32.mrf.mxu1 }
 0x50b   : > { %v1986_v6 = vsel %vm1345_vm3, %v4341_v5, -inf }
 0x50c   : > { %v1351_v28 = vpop.xlane.xlu1 %1350  ;;  %v4345_v10 = vpop.f32.mrf.mxu1  ;;  %1987 = vmax.xlane.f32.xlu1 %v1986_v6 }
 0x50d   : > { %v1395_v12 = vsub.f32 %v4206_v8, %v1351_v28 }
 0x50e   : > { %v1348_v17 = vpop.xlane.xlu0 %1347  ;;  %v4348_v19 = vpop.f32.mrf.mxu1 }
 0x50f   : > { %v1394_v21 = vsub.f32 %v4212_v11, %v1348_v17  ;;  %v1992_v24 = vsel %vm1345_vm3, %v4348_v19, -inf  ;;  %v1412_v25 = vmul.f32 1.442695, %v1395_v12 }
 0x510   : > { %v4353_v30 = vpop.f32.mrf.mxu1  ;;  %1993 = vmax.xlane.f32.xlu1 %v1992_v24 }
 0x511   : > { %v1410_v31 = vmul.f32 1.442695, %v1394_v21 }
 0x512   : > { %v1357_v34 = vpop.xlane.xlu0 %1356  ;;  %v4355_v44 = vpop.f32.mrf.mxu1 }
 0x513   : > { %3614 = vpow2.f32 %v1410_v31  ;;  %v1998_v8 = vsel %vm1345_vm3, %v4355_v44, -inf  ;;  %v1397_v37 = vsub.f32 %v4218_v14, %v1357_v34 }
 0x514   : > { %3616 = vpow2.f32 %v1412_v25  ;;  %1999 = vmax.xlane.f32.xlu1 %v1998_v8 }
 0x515   : > { %v1416_v46 = vmul.f32 1.442695, %v1397_v37 }
 0x516   : > { %v1360_v11 = vpop.xlane.xlu1 %1359  ;;  %v1354_v48 = vpop.xlane.xlu0 %1353 }
 0x517   : > { %v1398_v42 = vsub.f32 %v4236_v35, %v1360_v11  ;;  %v1396_v54 = vsub.f32 %v4222_v15, %v1354_v48 }
 0x519   : > { %v1414_v47 = vmul.f32 1.442695, %v1396_v54  ;;  %v1418_v50 = vmul.f32 1.442695, %v1398_v42 }
 0x51a   : > { %v1366_v52 = vpop.xlane.xlu1 %1365  ;;  %v1363_v55 = vpop.xlane.xlu0 %1362 }
 0x51b   : > { %v1400_v58 = vsub.f32 %v4249_v22, %v1366_v52  ;;  %v1399_v60 = vsub.f32 %v4230_v18, %v1363_v55  ;;  %3618 = vpow2.f32 %v1414_v47 }
 0x51c   : > { %3620 = vpow2.f32 %v1416_v46 }
 0x51d   : > { %v1420_v62 = vmul.f32 1.442695, %v1399_v60  ;;  %3622 = vpow2.f32 %v1418_v50  ;;  %v1422_v14 = vmul.f32 1.442695, %v1400_v58  ;;  %v1989_v50 = vsel %vm1345_vm3, %v4337_v3, -inf }
 0x51e   : > { %v1372_v63 = vpop.xlane.xlu1 %1371  ;;  %v1369_v1 = vpop.xlane.xlu0 %1368  ;;  %v1995_v58 = vsel %vm1345_vm3, %v4345_v10, -inf  ;;  %v2001_v60 = vsel %vm1345_vm3, %v4353_v30, -inf }
 0x51f   : > { %v1402_v35 = vsub.f32 %v4258_v29, %v1372_v63  ;;  %v1401_v15 = vsub.f32 %v4244_v23, %v1369_v1  ;;  %3624 = vpow2.f32 %v1420_v62 }
 0x520   : > { %v4366_v4 = vpop.eup %3614  ;;  %2110 = vrot.lane.b32.xlu0 %v4282_v41, %s3783_s20  ;;  %3626 = vpow2.f32 %v1422_v14 }
 0x521   : > { %v4370_v22 = vpop.eup %3616  ;;  %v1424_v18 = vmul.f32 1.442695, %v1401_v15  ;;  %3380 = vmatprep.mubr.msk.f32.mxu0 %vm1345_vm3, %v4366_v4  ;;  %v1426_v6 = vmul.f32 1.442695, %v1402_v35  ;;  %v1442_v14 = vsel %vm1345_vm3, %v4366_v4, 0.0 }
 0x522   : > { %v1378_v28 = vpop.xlane.xlu1 %1377  ;;  %3381 = vmatmul.mubr.msk.f32.vlgmr.msra.gmra.mxu0 %vm1345_vm3, %v4370_v22  ;;  %v1375_v29 = vpop.xlane.xlu0 %1374  ;;  %v1445_v62 = vsel %vm1345_vm3, %v4370_v22, 0.0 }
 0x523   : > { %v1404_v23 = vsub.f32 %v4266_v33, %v1378_v28  ;;  %3445 = vmatpush3.msra.mxu0 %v4202_v7  ;;  %v1403_v12 = vsub.f32 %v4256_v27, %v1375_v29  ;;  %3628 = vpow2.f32 %v1424_v18 }
 0x524   : > { %3446 = vmatprep.subr.mxu0 %v4216_v13  ;;  %3630 = vpow2.f32 %v1426_v6 }
 0x525   : > { %v1428_v41 = vmul.f32 1.442695, %v1403_v12  ;;  %3447 = vmatpush3.msra.mxu0 %v4216_v13  ;;  %2108 = vrot.lane.b32.xlu1 %v4290_v45, %s3783_s20  ;;  %v1430_v17 = vmul.f32 1.442695, %v1404_v23 }
 0x526   : > { %3448 = vmatprep.subr.mxu0 %v4208_v9  ;;  %v1384_v21 = vpop.xlane.xlu1 %1383  ;;  %v1381_v24 = vpop.xlane.xlu0 %1380 }
 0x527   : > { %v1406_v33 = vsub.f32 %v4276_v39, %v1384_v21  ;;  %3449 = vmatpush3.msra.mxu0 %v4208_v9  ;;  %v1405_v7 = vsub.f32 %v4264_v32, %v1381_v24  ;;  %3632 = vpow2.f32 %v1428_v41 }
 0x528   : > { %3450 = vmatprep.subr.mxu0 %v4224_v16  ;;  %v3619_v27 = vpop.eup %3618  ;;  %3634 = vpow2.f32 %v1430_v17 }
 0x529   : > { %v1432_v13 = vmul.f32 1.442695, %v1405_v7  ;;  %3451 = vmatpush3.msra.mxu0 %v4224_v16  ;;  %v3621_v45 = vpop.eup %3620  ;;  %v1434_v25 = vmul.f32 1.442695, %v1406_v33  ;;  %3383 = vmatprep.mubr.msk.f32.mxu0 %vm1345_vm3, %v3619_v27  ;;  %v1448_v1 = vsel %vm1345_vm3, %v3619_v27, 0.0 }
 0x52a   : > { %3452 = vmatprep.subr.mxu0 %v4233_v20  ;;  %v1387_v31 = vpop.xlane.xlu0 %1386  ;;  %v1390_v39 = vpop.xlane.xlu1 %1389  ;;  %3384 = vmatmul.mubr.msk.f32.gmra.mxu0 %vm1345_vm3, %v3621_v45  ;;  %v1451_v63 = vsel %vm1345_vm3, %v3621_v45, 0.0 }
 0x52b   : > { %v3623_v34 = vpop.eup %3622  ;;  %v1407_v9 = vsub.f32 %v4272_v36, %v1387_v31  ;;  %v1408_v32 = vsub.f32 %v4287_v43, %v1390_v39  ;;  %3636 = vpow2.f32 %v1432_v13  ;;  %3453 = vmatpush3.msra.mxu0 %v4233_v20 }
 0x52c   : > { %3386 = vmatprep.mubr.msk.f32.mxu0 %vm1345_vm3, %v3623_v34  ;;  %v3625_v16 = vpop.eup %3624  ;;  %3454 = vmatprep.subr.mxu0 %v4246_v38  ;;  %3638 = vpow2.f32 %v1434_v25  ;;  %v1454_v15 = vsel %vm1345_vm3, %v3623_v34, 0.0 }
 0x52d   : > { %v1436_v8 = vmul.f32 1.442695, %v1407_v9  ;;  %v1438_v37 = vmul.f32 1.442695, %v1408_v32  ;;  %3455 = vmatpush3.msra.mxu0 %v4246_v38  ;;  %v3627_v48 = vpop.eup %3626  ;;  %v1457_v35 = vsel %vm1345_vm3, %v3625_v16, 0.0 }
 0x52e   : > { %v1393_v11 = vpop.xlane.xlu0 %1392  ;;  %3387 = vmatmul.mubr.msk.f32.gmra.mxu0 %vm1345_vm3, %v3625_v16  ;;  %v1460_v22 = vsel %vm1345_vm3, %v3627_v48, 0.0 }
 0x52f   : > { %3640 = vpow2.f32 %v1436_v8  ;;  %v1409_v36 = vsub.f32 %v4280_v40, %v1393_v11  ;;  %3389 = vmatprep.mubr.msk.f32.mxu0 %vm1345_vm3, %v3627_v48 }
 0x530   : > { %v3629_v20 = vpop.eup %3628  ;;  %3642 = vpow2.f32 %v1438_v37 }
 0x531   : > { %v1440_v43 = vmul.f32 1.442695, %v1409_v36  ;;  %v3631_v42 = vpop.eup %3630  ;;  %v1463_v18 = vsel %vm1345_vm3, %v3629_v20, 0.0 }
 0x532   : > { %3390 = vmatmul.mubr.msk.f32.gmra.mxu0 %vm1345_vm3, %v3629_v20  ;;  %v1466_v6 = vsel %vm1345_vm3, %v3631_v42, 0.0 }
 0x533   : > { %3644 = vpow2.f32 %v1440_v43  ;;  %3392 = vmatprep.mubr.msk.f32.mxu0 %vm1345_vm3, %v3631_v42 }
 0x534   : > { %v3633_v54 = vpop.eup %3632 }
 0x535   : > { %v4403_v46 = vpop.eup %3634  ;;  %v1469_v4 = vsel %vm1345_vm3, %v3633_v54, 0.0 }
 0x536   : > { %3393 = vmatmul.mubr.msk.f32.gmra.mxu0 %vm1345_vm3, %v3633_v54 }
 0x537   : > { %3395 = vmatprep.mubr.msk.f32.mxu0 %vm1345_vm3, %v4403_v46 }
 0x538   : > { %v4408_v38 = vpop.eup %3636 }
 0x539   : > { %v4410_v40 = vpop.eup %3638 }
 0x53a   : > { %3396 = vmatmul.mubr.msk.f32.gmra.mxu0 %vm1345_vm3, %v4408_v38 }
 0x53b   : > { %3398 = vmatprep.mubr.msk.f32.mxu0 %vm1345_vm3, %v4410_v40 }
 0x53c   : > { %v4414_v47 = vpop.eup %3640 }
 0x53d   : > { %v4420_v52 = vpop.eup %3642 }
 0x53e   : > { %3399 = vmatmul.mubr.msk.f32.gmra.mxu0 %vm1345_vm3, %v4414_v47 }
 0x53f   : > { %1990 = vmax.xlane.f32.xlu0 %v1989_v50  ;;  %3401 = vmatprep.mubr.msk.f32.mxu0 %vm1345_vm3, %v4420_v52 }
 0x540   : > { %v4424_v55 = vpop.eup %3644 }
 0x542   : > { %3402 = vmatmul.mubr.msk.f32.gmra.mxu0 %vm1345_vm3, %v4424_v55 }
 0x543   : > { %1996 = vmax.xlane.f32.xlu0 %v1995_v58 }
 0x547   : > { %2002 = vmax.xlane.f32.xlu0 %v2001_v60 }
 0x54b   : > { %1446 = vadd.xlane.f32.xlu0 %v1445_v62 }
 0x54f   : > { %1443 = vadd.xlane.f32.xlu0 %v1442_v14 }
 0x553   : > { %1452 = vadd.xlane.f32.xlu0 %v1451_v63 }
 0x557   : > { %1449 = vadd.xlane.f32.xlu0 %v1448_v1 }
 0x55b   : > { %1458 = vadd.xlane.f32.xlu0 %v1457_v35 }
 0x55f   : > { %1455 = vadd.xlane.f32.xlu0 %v1454_v15 }
 0x563   : > { %1464 = vadd.xlane.f32.xlu0 %v1463_v18 }
 0x567   : > { %1461 = vadd.xlane.f32.xlu0 %v1460_v22 }
 0x56b   : > { %1470 = vadd.xlane.f32.xlu0 %v1469_v4 }
 0x56f   : > { %1467 = vadd.xlane.f32.xlu0 %v1466_v6 }
 0x57f   : > { %v1961_v28 = vpop.xlane.xlu0 %1960 }
 0x580   : > { %v2005_v29 = vsub.f32 %v4299_v57, %v1961_v28 }
 0x581   : > { %v1958_v23 = vpop.xlane.xlu1 %1957 }
 0x582   : > { %v2022_v12 = vmul.f32 1.442695, %v2005_v29  ;;  %v2004_v41 = vsub.f32 %v4303_v49, %v1958_v23 }
 0x583   : > { %v1967_v17 = vpop.xlane.xlu0 %1966 }
 0x584   : > { %3646 = vpow2.f32 %v2022_v12  ;;  %v2020_v21 = vmul.f32 1.442695, %v2004_v41  ;;  %v2007_v24 = vsub.f32 %v4307_v51, %v1967_v17  ;;  %v928_v12 = vld [vmem:[%s4633_s8] sm:$0xff] }
 0x585   : > { %v1964_v33 = vpop.xlane.xlu1 %1963 }
 0x586   : > { %3648 = vpow2.f32 %v2020_v21  ;;  %v2026_v7 = vmul.f32 1.442695, %v2007_v24  ;;  %v2006_v27 = vsub.f32 %v4311_v53, %v1964_v33  ;;  %v1472_v21 = vsel %vm1345_vm3, %v4403_v46, 0.0 }
 0x587   : > { %v1973_v13 = vpop.xlane.xlu0 %1972  ;;  %v1475_v33 = vsel %vm1345_vm3, %v4408_v38, 0.0  ;;  %v1478_v46 = vsel %vm1345_vm3, %v4410_v40, 0.0  ;;  %v1481_v38 = vsel %vm1345_vm3, %v4414_v47, 0.0 }
 0x588   : > { %3650 = vpow2.f32 %v2026_v7  ;;  %v2024_v45 = vmul.f32 1.442695, %v2006_v27  ;;  %v2009_v25 = vsub.f32 %v4315_v56, %v1973_v13  ;;  %v1484_v13 = vsel %vm1345_vm3, %v4420_v52, 0.0 }
 0x589   : > { %v1970_v57 = vpop.xlane.xlu1 %1969 }
 0x58a   : > { %3652 = vpow2.f32 %v2024_v45  ;;  %v2030_v49 = vmul.f32 1.442695, %v2009_v25  ;;  %v2008_v34 = vsub.f32 %v4319_v59, %v1970_v57  ;;  %v1487_v45 = vsel %vm1345_vm3, %v4424_v55, 0.0 }
 0x58b   : > { %v1979_v31 = vpop.xlane.xlu0 %1978 }
 0x58c   : > { %v2011_v39 = vsub.f32 %v4323_v61, %v1979_v31  ;;  %v2028_v56 = vmul.f32 1.442695, %v2008_v34 }
 0x58d   : > { %v1976_v9 = vpop.xlane.xlu1 %1975 }
 0x58e   : > { %v2034_v51 = vmul.f32 1.442695, %v2011_v39  ;;  %v2010_v32 = vsub.f32 %v4327_v26, %v1976_v9 }
 0x58f   : > { %v1985_v16 = vpop.xlane.xlu0 %1984 }
 0x590   : > { %3654 = vpow2.f32 %v2034_v51  ;;  %v2032_v53 = vmul.f32 1.442695, %v2010_v32  ;;  %v2013_v8 = vsub.f32 %v4331_v0, %v1985_v16 }
 0x591   : > { %v3647_v37 = vpop.eup %3646  ;;  %3656 = vpow2.f32 %v2030_v49 }
 0x592   : > { %3658 = vpow2.f32 %v2032_v53  ;;  %v2038_v11 = vmul.f32 1.442695, %v2013_v8  ;;  %v2055_v61 = vsel %vm1345_vm3, %v3647_v37, 0.0 }
 0x593   : > { %v3649_v48 = vpop.eup %3648  ;;  %v1982_v36 = vpop.xlane.xlu0 %1981  ;;  %2056 = vadd.xlane.f32.xlu1 %v2055_v61  ;;  %3660 = vpow2.f32 %v2028_v56 }
 0x594   : > { %v2012_v59 = vsub.f32 %v4335_v2, %v1982_v36  ;;  %3460 = vmatprep.mubr.msk.f32.mxu0 %vm1345_vm3, %v3649_v48  ;;  %v2052_v26 = vsel %vm1345_vm3, %v3649_v48, 0.0  ;;  %3662 = vpow2.f32 %v2038_v11 }
 0x595   : > { %2053 = vadd.xlane.f32.xlu0 %v2052_v26  ;;  %v1988_v20 = vpop.xlane.xlu1 %1987  ;;  %v3651_v0 = vpop.eup %3650 }
 0x596   : > { %v2036_v43 = vmul.f32 1.442695, %v2012_v59  ;;  %v2061_v54 = vsel %vm1345_vm3, %v3651_v0, 0.0  ;;  %v2014_v15 = vsub.f32 %v4341_v5, %v1988_v20 }
 0x597   : > { %v2111_v42 = vpop.permute.xlu0 %2110  ;;  %v3653_v2 = vpop.eup %3652 }
 0x598   : > { %3456 = vmatprep.subr.mxu0 %v2111_v42  ;;  %3546 = vmatprep.subr.mxu1 %v2111_v42  ;;  %3664 = vpow2.f32 %v2036_v43  ;;  %v2058_v60 = vsel %vm1345_vm3, %v3653_v2, 0.0  ;;  %v2040_v23 = vmul.f32 1.442695, %v2014_v15 }
 0x599   : > { %3457 = vmatpush3.msra.mxu0 %v2111_v42  ;;  %3554 = vmatpush3.msra.mxu1 %v2111_v42  ;;  %v4460_v50 = vpop.xlane.xlu1 %1993 }
 0x59a   : > { %2062 = vadd.xlane.f32.xlu0 %v2061_v54  ;;  %v2016_v40 = vsub.f32 %v4348_v19, %v4460_v50  ;;  %v930_v54 = vld [vmem:[%s4633_s8 + $0x10] sm:$0xff] }
 0x59c   : > { %v2044_v31 = vmul.f32 1.442695, %v2016_v40 }
 0x59d   : > { %v3655_v58 = vpop.eup %3654  ;;  %v2000_v62 = vpop.xlane.xlu1 %1999 }
 0x59e   : > { %v3657_v14 = vpop.eup %3656  ;;  %2059 = vadd.xlane.f32.xlu0 %v2058_v60  ;;  %v2018_v63 = vsub.f32 %v4355_v44, %v2000_v62  ;;  %v2073_v1 = vsel %vm1345_vm3, %v3655_v58, 0.0  ;;  %v929_v44 = vld [vmem:[%s4633_s8 + $0x8] sm:$0xff] }
 0x59f   : > { %v3659_v35 = vpop.eup %3658  ;;  %2074 = vadd.xlane.f32.xlu1 %v2073_v1  ;;  %v2067_v22 = vsel %vm1345_vm3, %v3657_v14, 0.0 }
 0x5a0   : > { %v2048_v18 = vmul.f32 1.442695, %v2018_v63  ;;  %v3661_v6 = vpop.eup %3660  ;;  %v2070_v28 = vsel %vm1345_vm3, %v3659_v35, 0.0 }
 0x5a1   : > { %v2109_v4 = vpop.permute.xlu1 %2108  ;;  %v3663_v29 = vpop.eup %3662  ;;  %v2064_v5 = vsel %vm1345_vm3, %v3661_v6, 0.0 }
 0x5a2   : > { %3666 = vpow2.f32 %v2048_v18  ;;  %2068 = vadd.xlane.f32.xlu0 %v2067_v22  ;;  %3458 = vmatprep.subr.mxu0 %v2109_v4  ;;  %v2079_v41 = vsel %vm1345_vm3, %v3663_v29, 0.0 }
 0x5a3   : > { %2071 = vadd.xlane.f32.xlu1 %v2070_v28  ;;  %3459 = vmatpush3.msra.mxu0 %v2109_v4  ;;  %3668 = vpow2.f32 %v2040_v23 }
 0x5a4   : > { %3461 = vmatmul.mubr.msk.f32.vlgmr.msra.gmra.mxu0 %vm1345_vm3, %v3647_v37  ;;  %3547 = vmatprep.subr.mxu1 %v2109_v4 }
 0x5a5   : > { %3463 = vmatprep.mubr.msk.f32.mxu0 %vm1345_vm3, %v3653_v2  ;;  %3555 = vmatpush3.msra.mxu1 %v2109_v4  ;;  %v3665_v17 = vpop.eup %3664 }
 0x5a6   : > { %2065 = vadd.xlane.f32.xlu0 %v2064_v5  ;;  %3512 = vmatprep.subr.mxu0 %v929_v44  ;;  %v2076_v24 = vsel %vm1345_vm3, %v3665_v17, 0.0 }
 0x5a7   : > { %2080 = vadd.xlane.f32.xlu1 %v2079_v41  ;;  %3513 = vmatpush3.msra.mxu0 %v929_v44 }
 0x5a8   : > { %3464 = vmatmul.mubr.msk.f32.gmra.mxu0 %vm1345_vm3, %v3651_v0  ;;  %3514 = vmatprep.subr.mxu0 %v928_v12  ;;  %v931_v0 = vld [vmem:[%s4633_s8 + $0x18] sm:$0xff] }
 0x5a9   : > { %3466 = vmatprep.mubr.msk.f32.mxu0 %vm1345_vm3, %v3661_v6  ;;  %3515 = vmatpush3.msra.mxu0 %v928_v12 }
 0x5aa   : > { %1473 = vadd.xlane.f32.xlu0 %v1472_v21  ;;  %3484 = vmatprep.subr.mxu1 %v931_v0 }
 0x5ab   : > { %2077 = vadd.xlane.f32.xlu1 %v2076_v24 }
 0x5ac   : > { %3467 = vmatmul.mubr.msk.f32.gmra.mxu0 %vm1345_vm3, %v3657_v14 }
 0x5ad   : > { %3469 = vmatprep.mubr.msk.f32.mxu0 %vm1345_vm3, %v3659_v35 }
 0x5ae   : > { %1476 = vadd.xlane.f32.xlu0 %v1475_v33 }
 0x5af   : > { %v4487_v7 = vpop.eup %3666 }
 0x5b0   : > { %3470 = vmatmul.mubr.msk.f32.gmra.mxu0 %vm1345_vm3, %v3655_v58  ;;  %3481 = vmatprep.mubr.msk.f32.mxu1 %vm1345_vm3, %v4487_v7  ;;  %v3669_v27 = vpop.eup %3668  ;;  %v2094_v2 = vsel %vm1345_vm3, %v4487_v7, 0.0 }
 0x5b1   : > { %3472 = vmatprep.mubr.msk.f32.mxu0 %vm1345_vm3, %v3665_v17 }
 0x5b2   : > { %1479 = vadd.xlane.f32.xlu0 %v1478_v46 }
 0x5b4   : > { %3473 = vmatmul.mubr.msk.f32.gmra.mxu0 %vm1345_vm3, %v3663_v29 }
 0x5b5   : > { %3475 = vmatprep.mubr.msk.f32.mxu0 %vm1345_vm3, %v3669_v27 }
 0x5b6   : > { %1482 = vadd.xlane.f32.xlu0 %v1481_v38 }
 0x5ba   : > { %1485 = vadd.xlane.f32.xlu0 %v1484_v13 }
 0x5be   : > { %1488 = vadd.xlane.f32.xlu0 %v1487_v45 }
 0x5c8   : > { %v1991_v25 = vpop.xlane.xlu0 %1990 }
 0x5c9   : > { %v2015_v57 = vsub.f32 %v4337_v3, %v1991_v25 }
 0x5cb   : > { %v2042_v39 = vmul.f32 1.442695, %v2015_v57 }
 0x5cc   : > { %v1997_v47 = vpop.xlane.xlu0 %1996 }
 0x5cd   : > { %3670 = vpow2.f32 %v2042_v39  ;;  %v2017_v49 = vsub.f32 %v4345_v10, %v1997_v47 }
 0x5ce   : > { %3672 = vpow2.f32 %v2044_v31 }
 0x5cf   : > { %v2046_v34 = vmul.f32 1.442695, %v2017_v49 }
 0x5d0   : > { %v2003_v52 = vpop.xlane.xlu0 %2002 }
 0x5d1   : > { %3674 = vpow2.f32 %v2046_v34  ;;  %v2019_v9 = vsub.f32 %v4353_v30, %v2003_v52  ;;  %v2082_v30 = vsel %vm1345_vm3, %v3669_v27, 0.0 }
 0x5d3   : > { %v2050_v55 = vmul.f32 1.442695, %v2019_v9 }
 0x5d4   : > { %v1447_v51 = vpop.xlane.xlu0 %1446 }
 0x5d5   : > { %3676 = vpow2.f32 %v2050_v55 }
 0x5d6   : > { %3678 = vrcp.f32 %v1447_v51 }
 0x5d8   : > { %v1444_v19 = vpop.xlane.xlu0 %1443 }
 0x5d9   : > { %3680 = vrcp.f32 %v1444_v19 }
 0x5da   : > { %v3671_v32 = vpop.eup %3670 }
 0x5db   : > { %v3673_v3 = vpop.eup %3672  ;;  %3476 = vmatmul.mubr.msk.f32.gmra.mxu0 %vm1345_vm3, %v3671_v32  ;;  %v2085_v16 = vsel %vm1345_vm3, %v3671_v32, 0.0 }
 0x5dc   : > { %v1453_v53 = vpop.xlane.xlu0 %1452  ;;  %2086 = vadd.xlane.f32.xlu1 %v2085_v16  ;;  %3478 = vmatprep.mubr.msk.f32.mxu0 %vm1345_vm3, %v3673_v3  ;;  %v2088_v20 = vsel %vm1345_vm3, %v3673_v3, 0.0 }
 0x5dd   : > { %3682 = vrcp.f32 %v1453_v53 }
 0x5de   : > { %v3675_v10 = vpop.eup %3674 }
 0x5df   : > { %3479 = vmatmul.mubr.msk.f32.gmra.mxu0 %vm1345_vm3, %v3675_v10  ;;  %v2091_v11 = vsel %vm1345_vm3, %v3675_v10, 0.0 }
 0x5e0   : > { %v1450_v8 = vpop.xlane.xlu0 %1449  ;;  %2083 = vadd.xlane.f32.xlu1 %v2082_v30 }
 0x5e1   : > { %3684 = vrcp.f32 %v1450_v8 }
 0x5e2   : > { %v3677_v37 = vpop.eup %3676  ;;  %v3382_v56 = vpop.f32.mrf.mxu0 }
 0x5e3   : > { %3482 = vmatmul.mubr.msk.f32.vlgmr.msra.gmra.mxu1 %vm1345_vm3, %v3677_v37  ;;  %v3679_v48 = vpop.eup %3678  ;;  %v2097_v1 = vsel %vm1345_vm3, %v3677_v37, 0.0 }
 0x5e4   : > { %v1459_v61 = vpop.xlane.xlu0 %1458  ;;  %2092 = vadd.xlane.f32.xlu1 %v2091_v11  ;;  %v1604_v59 = vpop.f32.mrf.mxu0  ;;  %v1700_v43 = vmul.f32 %v3679_v48, %v3382_v56  ;;  %3485 = vmatpush3.msra.mxu1 %v931_v0 }
 0x5e5   : > { %3686 = vrcp.f32 %v1459_v61  ;;  %3486 = vmatprep.subr.mxu1 %v930_v54 }
 0x5e6   : > { %v3681_v36 = vpop.eup %3680  ;;  %3487 = vmatpush3.msra.mxu1 %v930_v54 }
 0x5e7   : > { %v1699_v26 = vmul.f32 %v3681_v36, %v1604_v59 }
 0x5e8   : > { %v1456_v42 = vpop.xlane.xlu0 %1455  ;;  %2089 = vadd.xlane.f32.xlu1 %v2088_v20 }
 0x5e9   : > { %3688 = vrcp.f32 %v1456_v42  ;;  %3516 = vmatprep.mubr.msk.f32.mxu0 %vm1127_vm2, %v1699_v26 }
 0x5ea   : > { %3517 = vmatmul.mubr.msk.f32.vlgmr.msra.gmra.mxu0 %vm1127_vm2, %v1700_v43  ;;  %v3385_v50 = vpop.f32.mrf.mxu0  ;;  %v3683_v60 = vpop.eup %3682 }
 0x5eb   : > { %v1702_v35 = vmul.f32 %v3683_v60, %v3385_v50 }
 0x5ec   : > { %v1465_v58 = vpop.xlane.xlu0 %1464  ;;  %2095 = vadd.xlane.f32.xlu1 %v2094_v2  ;;  %v1614_v14 = vpop.f32.mrf.mxu0 }
 0x5ed   : > { %3690 = vrcp.f32 %v1465_v58 }
 0x5ee   : > { %v3685_v62 = vpop.eup %3684  ;;  %v3388_v18 = vpop.f32.mrf.mxu0 }
 0x5ef   : > { %v1701_v63 = vmul.f32 %v3685_v62, %v1614_v14 }
 0x5f0   : > { %v1462_v15 = vpop.xlane.xlu0 %1461  ;;  %2098 = vadd.xlane.f32.xlu1 %v2097_v1  ;;  %v1624_v28 = vpop.f32.mrf.mxu0 }
 0x5f1   : > { %3692 = vrcp.f32 %v1462_v15  ;;  %3519 = vmatprep.mubr.msk.f32.mxu0 %vm1127_vm2, %v1701_v63 }
 0x5f2   : > { %3520 = vmatmul.mubr.msk.f32.gmra.mxu0 %vm1127_vm2, %v1702_v35  ;;  %v3687_v4 = vpop.eup %3686  ;;  %v3391_v5 = vpop.f32.mrf.mxu0 }
 0x5f3   : > { %v1704_v23 = vmul.f32 %v3687_v4, %v3388_v18 }
 0x5f4   : > { %v1471_v22 = vpop.xlane.xlu0 %1470  ;;  %v1634_v17 = vpop.f32.mrf.mxu0 }
 0x5f5   : > { %3694 = vrcp.f32 %v1471_v22 }
 0x5f6   : > { %v3689_v6 = vpop.eup %3688  ;;  %v3394_v33 = vpop.f32.mrf.mxu0 }
 0x5f7   : > { %v1703_v29 = vmul.f32 %v3689_v6, %v1624_v28 }
 0x5f8   : > { %v1468_v44 = vpop.xlane.xlu0 %1467  ;;  %v1644_v27 = vpop.f32.mrf.mxu0 }
 0x5f9   : > { %3696 = vrcp.f32 %v1468_v44  ;;  %3522 = vmatprep.mubr.msk.f32.mxu0 %vm1127_vm2, %v1703_v29 }
 0x5fa   : > { %3523 = vmatmul.mubr.msk.f32.gmra.mxu0 %vm1127_vm2, %v1704_v23  ;;  %v3691_v12 = vpop.eup %3690  ;;  %v3397_v34 = vpop.f32.mrf.mxu0 }
 0x5fb   : > { %v1706_v24 = vmul.f32 %v3691_v12, %v3391_v5 }
 0x5fc   : > { %v1654_v55 = vpop.f32.mrf.mxu0 }
 0x5fe   : > { %v3693_v41 = vpop.eup %3692  ;;  %v3400_v3 = vpop.f32.mrf.mxu0 }
 0x5ff   : > { %v1705_v21 = vmul.f32 %v3693_v41, %v1634_v17 }
 0x600   : > { %v1664_v30 = vpop.f32.mrf.mxu0 }
 0x601   : > { %3525 = vmatprep.mubr.msk.f32.mxu0 %vm1127_vm2, %v1705_v21 }
 0x602   : > { %3526 = vmatmul.mubr.msk.f32.gmra.mxu0 %vm1127_vm2, %v1706_v24  ;;  %v3695_v7 = vpop.eup %3694  ;;  %v3403_v56 = vpop.f32.mrf.mxu0 }
 0x603   : > { %v1708_v13 = vmul.f32 %v3695_v7, %v3394_v33 }
 0x604   : > { %v1674_v36 = vpop.f32.mrf.mxu0 }
 0x606   : > { %v3697_v46 = vpop.eup %3696 }
 0x607   : > { %v1707_v38 = vmul.f32 %v3697_v46, %v1644_v27 }
 0x609   : > { %3528 = vmatprep.mubr.msk.f32.mxu0 %vm1127_vm2, %v1707_v38 }
 0x60a   : > { %3529 = vmatmul.mubr.msk.f32.gmra.mxu0 %vm1127_vm2, %v1708_v13 }
 0x61c   : > { %v2057_v61 = vpop.xlane.xlu1 %2056 }
 0x61e   : > { %v2054_v45 = vpop.xlane.xlu0 %2053 }
 0x623   : > { %v2063_v40 = vpop.xlane.xlu0 %2062 }
 0x627   : > { %v2060_v25 = vpop.xlane.xlu0 %2059 }
 0x628   : > { %v2075_v26 = vpop.xlane.xlu1 %2074 }
 0x62b   : > { %v2069_v57 = vpop.xlane.xlu0 %2068 }
 0x62c   : > { %v2072_v43 = vpop.xlane.xlu1 %2071 }
 0x62f   : > { %v2066_v31 = vpop.xlane.xlu0 %2065 }
 0x630   : > { %v2081_v42 = vpop.xlane.xlu1 %2080 }
 0x633   : > { %v1474_v39 = vpop.xlane.xlu0 %1473 }
 0x634   : > { %3698 = vrcp.f32 %v1474_v39  ;;  %v2078_v2 = vpop.xlane.xlu1 %2077 }
 0x637   : > { %v1477_v47 = vpop.xlane.xlu0 %1476 }
 0x638   : > { %3700 = vrcp.f32 %v1477_v47 }
 0x63b   : > { %v1480_v49 = vpop.xlane.xlu0 %1479 }
 0x63c   : > { %3702 = vrcp.f32 %v1480_v49 }
 0x63f   : > { %v1483_v52 = vpop.xlane.xlu0 %1482 }
 0x640   : > { %3704 = vrcp.f32 %v1483_v52 }
 0x641   : > { %v3699_v9 = vpop.eup %3698 }
 0x642   : > { %v1709_v51 = vmul.f32 %v3699_v9, %v1654_v55 }
 0x643   : > { %v1486_v19 = vpop.xlane.xlu0 %1485 }
 0x644   : > { %3706 = vrcp.f32 %v1486_v19  ;;  %3531 = vmatprep.mubr.msk.f32.mxu0 %vm1127_vm2, %v1709_v51 }
 0x645   : > { %v3701_v32 = vpop.eup %3700 }
 0x646   : > { %v1710_v16 = vmul.f32 %v3701_v32, %v3397_v34 }
 0x647   : > { %v1489_v53 = vpop.xlane.xlu0 %1488 }
 0x648   : > { %3708 = vrcp.f32 %v1489_v53  ;;  %3532 = vmatmul.mubr.msk.f32.gmra.mxu0 %vm1127_vm2, %v1710_v16 }
 0x649   : > { %v3703_v10 = vpop.eup %3702  ;;  %3710 = vrcp.f32 %v2054_v45 }
 0x64a   : > { %v1711_v8 = vmul.f32 %v3703_v10, %v1664_v30  ;;  %3712 = vrcp.f32 %v2057_v61 }
 0x64b   : > { %3714 = vrcp.f32 %v2060_v25 }
 0x64c   : > { %3534 = vmatprep.mubr.msk.f32.mxu0 %vm1127_vm2, %v1711_v8  ;;  %3716 = vrcp.f32 %v2063_v40 }
 0x64d   : > { %v3705_v37 = vpop.eup %3704  ;;  %3718 = vrcp.f32 %v2066_v31 }
 0x64e   : > { %v1712_v11 = vmul.f32 %v3705_v37, %v3400_v3  ;;  %3720 = vrcp.f32 %v2069_v57 }
 0x64f   : > { %3722 = vrcp.f32 %v2072_v43 }
 0x650   : > { %3535 = vmatmul.mubr.msk.f32.gmra.mxu0 %vm1127_vm2, %v1712_v11  ;;  %3724 = vrcp.f32 %v2075_v26  ;;  %v4560_v26 = vld [vmem:[%s4634_s9] ss:$0 sm:$0xff] }
 0x651   : > { %v3707_v48 = vpop.eup %3706  ;;  %3726 = vrcp.f32 %v2078_v2 }
 0x652   : > { %v1713_v59 = vmul.f32 %v3707_v48, %v1674_v36  ;;  %3728 = vrcp.f32 %v2081_v42 }
 0x654   : > { %3537 = vmatprep.mubr.msk.f32.mxu0 %vm1127_vm2, %v1713_v59 }
 0x655   : > { %v3709_v20 = vpop.eup %3708 }
 0x656   : > { %v1714_v0 = vmul.f32 %v3709_v20, %v3403_v56  ;;  %v3711_v50 = vpop.eup %3710 }
 0x657   : > { %v3713_v60 = vpop.eup %3712 }
 0x658   : > { %3538 = vmatmul.mubr.msk.f32.gmra.mxu0 %vm1127_vm2, %v1714_v0  ;;  %v3715_v1 = vpop.eup %3714 }
 0x659   : > { %v3717_v15 = vpop.eup %3716 }
 0x65a   : > { %v3719_v6 = vpop.eup %3718 }
 0x65b   : > { %v3721_v29 = vpop.eup %3720 }
 0x65c   : > { %v3723_v12 = vpop.eup %3722 }
 0x65d   : > { %v3725_v17 = vpop.eup %3724 }
 0x65e   : > { %v3727_v7 = vpop.eup %3726 }
 0x65f   : > { %v3729_v27 = vpop.eup %3728 }
 0x664   : > { %v3462_v54 = vpop.f32.mrf.mxu0 }
 0x665   : > { %v2342_v14 = vmul.f32 %v3713_v60, %v3462_v54  ;;  %v2087_v13 = vpop.xlane.xlu1 %2086 }
 0x666   : > { %v2246_v58 = vpop.f32.mrf.mxu0 }
 0x667   : > { %v2341_v62 = vmul.f32 %v3711_v50, %v2246_v58 }
 0x668   : > { %v3465_v63 = vpop.f32.mrf.mxu0 }
 0x669   : > { %3488 = vmatprep.mubr.msk.f32.mxu1 %vm1127_vm2, %v2341_v62  ;;  %v2344_v22 = vmul.f32 %v3717_v15, %v3465_v63  ;;  %v2084_v40 = vpop.xlane.xlu1 %2083 }
 0x66a   : > { %v2256_v35 = vpop.f32.mrf.mxu0  ;;  %3489 = vmatmul.mubr.msk.f32.vlgmr.msra.gmra.mxu1 %vm1127_vm2, %v2342_v14  ;;  %3730 = vrcp.f32 %v2084_v40 }
 0x66b   : > { %v2343_v18 = vmul.f32 %v3715_v1, %v2256_v35  ;;  %3732 = vrcp.f32 %v2087_v13 }
 0x66c   : > { %v3468_v4 = vpop.f32.mrf.mxu0 }
 0x66d   : > { %3491 = vmatprep.mubr.msk.f32.mxu1 %vm1127_vm2, %v2343_v18  ;;  %v2346_v44 = vmul.f32 %v3721_v29, %v3468_v4  ;;  %v2093_v25 = vpop.xlane.xlu1 %2092 }
 0x66e   : > { %v2266_v28 = vpop.f32.mrf.mxu0  ;;  %3492 = vmatmul.mubr.msk.f32.gmra.mxu1 %vm1127_vm2, %v2344_v22 }
 0x66f   : > { %v2345_v23 = vmul.f32 %v3719_v6, %v2266_v28 }
 0x670   : > { %v3471_v5 = vpop.f32.mrf.mxu0 }
 0x671   : > { %3494 = vmatprep.mubr.msk.f32.mxu1 %vm1127_vm2, %v2345_v23  ;;  %v2348_v24 = vmul.f32 %v3725_v17, %v3471_v5  ;;  %v2090_v57 = vpop.xlane.xlu1 %2089 }
 0x672   : > { %v2276_v41 = vpop.f32.mrf.mxu0  ;;  %3495 = vmatmul.mubr.msk.f32.gmra.mxu1 %vm1127_vm2, %v2346_v44  ;;  %3734 = vrcp.f32 %v2090_v57 }
 0x673   : > { %v2347_v21 = vmul.f32 %v3723_v12, %v2276_v41  ;;  %3736 = vrcp.f32 %v2093_v25 }
 0x674   : > { %v3474_v33 = vpop.f32.mrf.mxu0 }
 0x675   : > { %3497 = vmatprep.mubr.msk.f32.mxu1 %vm1127_vm2, %v2347_v21  ;;  %v2350_v45 = vmul.f32 %v3729_v27, %v3474_v33  ;;  %v2096_v31 = vpop.xlane.xlu1 %2095 }
 0x676   : > { %v2286_v46 = vpop.f32.mrf.mxu0  ;;  %3498 = vmatmul.mubr.msk.f32.gmra.mxu1 %vm1127_vm2, %v2348_v24  ;;  %3738 = vrcp.f32 %v2096_v31 }
 0x677   : > { %v2349_v38 = vmul.f32 %v3727_v7, %v2286_v46  ;;  %v3731_v49 = vpop.eup %3730 }
 0x678   : > { %v3733_v52 = vpop.eup %3732 }
 0x679   : > { %3500 = vmatprep.mubr.msk.f32.mxu1 %vm1127_vm2, %v2349_v38  ;;  %v2099_v39 = vpop.xlane.xlu1 %2098 }
 0x67a   : > { %3501 = vmatmul.mubr.msk.f32.gmra.mxu1 %vm1127_vm2, %v2350_v45  ;;  %3740 = vrcp.f32 %v2099_v39 }
 0x67f   : > { %v3735_v19 = vpop.eup %3734 }
 0x680   : > { %v3737_v3 = vpop.eup %3736 }
 0x683   : > { %v3739_v30 = vpop.eup %3738 }
 0x687   : > { %v3741_v37 = vpop.eup %3740 }
 0x69b   : > { %v3477_v47 = vpop.f32.mrf.mxu0 }
 0x69c   : > { %v2352_v55 = vmul.f32 %v3733_v52, %v3477_v47 }
 0x69d   : > { %v2296_v34 = vpop.f32.mrf.mxu0 }
 0x69e   : > { %v2351_v9 = vmul.f32 %v3731_v49, %v2296_v34 }
 0x69f   : > { %v3480_v51 = vpop.f32.mrf.mxu0 }
 0x6a0   : > { %3503 = vmatprep.mubr.msk.f32.mxu1 %vm1127_vm2, %v2351_v9  ;;  %v2354_v53 = vmul.f32 %v3737_v3, %v3480_v51 }
 0x6a1   : > { %v2306_v32 = vpop.f32.mrf.mxu0  ;;  %3504 = vmatmul.mubr.msk.f32.gmra.mxu1 %vm1127_vm2, %v2352_v55 }
 0x6a2   : > { %v2353_v16 = vmul.f32 %v3735_v19, %v2306_v32 }
 0x6a3   : > { %v3483_v10 = vpop.f32.mrf.mxu1 }
 0x6a4   : > { %3506 = vmatprep.mubr.msk.f32.mxu1 %vm1127_vm2, %v2353_v16  ;;  %v2356_v11 = vmul.f32 %v3741_v37, %v3483_v10 }
 0x6a5   : > { %v2316_v8 = vpop.f32.mrf.mxu1  ;;  %3507 = vmatmul.mubr.msk.f32.gmra.mxu1 %vm1127_vm2, %v2354_v53 }
 0x6a6   : > { %v2355_v56 = vmul.f32 %v3739_v30, %v2316_v8 }
 0x6a8   : > { %3509 = vmatprep.mubr.msk.f32.mxu1 %vm1127_vm2, %v2355_v56 }
 0x6a9   : > { %3510 = vmatmul.mubr.msk.f32.gmra.mxu1 %vm1127_vm2, %v2356_v11 }
 0x6aa   : > { %v3518_v61 = vpop.f32.mrf.mxu0 }
 0x6ac   : > { %v2664_v48 = vpop.f32.mrf.mxu0 }
 0x6b2   : > { %v3521_v36 = vpop.f32.mrf.mxu0 }
 0x6b4   : > { %v2674_v59 = vpop.f32.mrf.mxu0 }
 0x6ba   : > { %v3524_v43 = vpop.f32.mrf.mxu0 }
 0x6bc   : > { %v2684_v62 = vpop.f32.mrf.mxu0 }
 0x6c2   : > { %v3527_v35 = vpop.f32.mrf.mxu0 }
 0x6c4   : > { %v2694_v29 = vpop.f32.mrf.mxu0 }
 0x6ca   : > { %v3530_v12 = vpop.f32.mrf.mxu0 }
 0x6cc   : > { %v2704_v46 = vpop.f32.mrf.mxu0 }
 0x708   : > { %v3533_v40 = vpop.f32.mrf.mxu0 }
 0x70a   : > { %v2714_v25 = vpop.f32.mrf.mxu0 }
 0x710   : > { %v3536_v57 = vpop.f32.mrf.mxu0 }
 0x712   : > { %v2724_v52 = vpop.f32.mrf.mxu0 }
 0x718   : > { %v3539_v19 = vpop.f32.mrf.mxu0 }
 0x71a   : > { %v2734_v8 = vpop.f32.mrf.mxu0 }
 0x72a   : > { %v3490_v20 = vpop.f32.mrf.mxu1 }
 0x72b   : > { %v2670_v0 = vadd.f32 %v3518_v61, %v3490_v20 }
 0x72c   : > { %v2471_v42 = vpop.f32.mrf.mxu1 }
 0x72d   : > { %v2750_v54 = vadd.f32 %v4560_v26, %v2670_v0  ;;  %v2665_v50 = vadd.f32 %v2664_v48, %v2471_v42 }
 0x72e   : > { %v3493_v2 = vpop.f32.mrf.mxu1 }
 0x72f   : > { %2766 = vst.msk [vmem:[%s3882_s19 + $0x8] sm:$0xff] %vm933_vm1, %v2750_v54  ;;  %v2749_v58 = vadd.f32 %v4560_v26, %v2665_v50  ;;  %v2680_v60 = vadd.f32 %v3521_v36, %v3493_v2 }
 0x730   : > { %v2481_v14 = vpop.f32.mrf.mxu1 }
 0x731   : > { %2765 = vst.msk [vmem:[%s3882_s19] sm:$0xff] %vm933_vm1, %v2749_v58  ;;  %v2752_v63 = vadd.f32 %v4560_v26, %v2680_v60  ;;  %v2675_v1 = vadd.f32 %v2674_v59, %v2481_v14 }
 0x732   : > { %v3496_v15 = vpop.f32.mrf.mxu1 }
 0x733   : > { %2768 = vst.msk [vmem:[%s3882_s19 + $0x18] sm:$0xff] %vm933_vm1, %v2752_v63  ;;  %v2751_v18 = vadd.f32 %v4560_v26, %v2675_v1  ;;  %v2690_v22 = vadd.f32 %v3524_v43, %v3496_v15 }
 0x734   : > { %v2491_v4 = vpop.f32.mrf.mxu1 }
 0x735   : > { %2767 = vst.msk [vmem:[%s3882_s19 + $0x10] sm:$0xff] %vm933_vm1, %v2751_v18  ;;  %v2754_v6 = vadd.f32 %v4560_v26, %v2690_v22  ;;  %v2685_v28 = vadd.f32 %v2684_v62, %v2491_v4 }
 0x736   : > { %v3499_v23 = vpop.f32.mrf.mxu1 }
 0x737   : > { %2770 = vst.msk [vmem:[%s3882_s19 + $0x28] sm:$0xff] %vm933_vm1, %v2754_v6  ;;  %v2753_v44 = vadd.f32 %v4560_v26, %v2685_v28  ;;  %v2700_v5 = vadd.f32 %v3527_v35, %v3499_v23 }
 0x738   : > { %v2501_v41 = vpop.f32.mrf.mxu1 }
 0x739   : > { %2769 = vst.msk [vmem:[%s3882_s19 + $0x20] sm:$0xff] %vm933_vm1, %v2753_v44  ;;  %v2756_v17 = vadd.f32 %v4560_v26, %v2700_v5  ;;  %v2695_v21 = vadd.f32 %v2694_v29, %v2501_v41 }
 0x73a   : > { %v3502_v24 = vpop.f32.mrf.mxu1 }
 0x73b   : > { %2772 = vst.msk [vmem:[%s3882_s19 + $0x38] sm:$0xff] %vm933_vm1, %v2756_v17  ;;  %v2755_v33 = vadd.f32 %v4560_v26, %v2695_v21  ;;  %v2710_v7 = vadd.f32 %v3530_v12, %v3502_v24 }
 0x73c   : > { %v2511_v27 = vpop.f32.mrf.mxu1 }
 0x73d   : > { %2771 = vst.msk [vmem:[%s3882_s19 + $0x30] sm:$0xff] %vm933_vm1, %v2755_v33  ;;  %v2758_v38 = vadd.f32 %v4560_v26, %v2710_v7  ;;  %v2705_v13 = vadd.f32 %v2704_v46, %v2511_v27 }
 0x73f   : > { %2774 = vst.msk [vmem:[%s3882_s19 + $0x48] sm:$0xff] %vm933_vm1, %v2758_v38  ;;  %v2757_v45 = vadd.f32 %v4560_v26, %v2705_v13 }
 0x741   : > { %2773 = vst.msk [vmem:[%s3882_s19 + $0x40] sm:$0xff] %vm933_vm1, %v2757_v45 }
 0x761   : > { %v3505_v31 = vpop.f32.mrf.mxu1 }
 0x762   : > { %v2720_v39 = vadd.f32 %v3533_v40, %v3505_v31 }
 0x763   : > { %v2521_v47 = vpop.f32.mrf.mxu1 }
 0x764   : > { %v2760_v49 = vadd.f32 %v4560_v26, %v2720_v39  ;;  %v2715_v34 = vadd.f32 %v2714_v25, %v2521_v47 }
 0x765   : > { %v3508_v9 = vpop.f32.mrf.mxu1 }
 0x766   : > { %2776 = vst.msk [vmem:[%s3882_s19 + $0x58] sm:$0xff] %vm933_vm1, %v2760_v49  ;;  %v2759_v55 = vadd.f32 %v4560_v26, %v2715_v34  ;;  %v2730_v51 = vadd.f32 %v3536_v57, %v3508_v9 }
 0x767   : > { %v2531_v32 = vpop.f32.mrf.mxu1 }
 0x768   : > { %2775 = vst.msk [vmem:[%s3882_s19 + $0x50] sm:$0xff] %vm933_vm1, %v2759_v55  ;;  %v2762_v3 = vadd.f32 %v4560_v26, %v2730_v51  ;;  %v2725_v16 = vadd.f32 %v2724_v52, %v2531_v32 }
 0x769   : > { %v3511_v53 = vpop.f32.mrf.mxu1 }
 0x76a   : > { %2778 = vst.msk [vmem:[%s3882_s19 + $0x68] sm:$0xff] %vm933_vm1, %v2762_v3  ;;  %v2761_v10 = vadd.f32 %v4560_v26, %v2725_v16  ;;  %v2740_v30 = vadd.f32 %v3539_v19, %v3511_v53 }
 0x76b   : > { %v2541_v37 = vpop.f32.mrf.mxu1 }
 0x76c   : > { %2777 = vst.msk [vmem:[%s3882_s19 + $0x60] sm:$0xff] %vm933_vm1, %v2761_v10  ;;  %v2764_v56 = vadd.f32 %v4560_v26, %v2740_v30  ;;  %v2735_v11 = vadd.f32 %v2734_v8, %v2541_v37 }
 0x76e   : > { %2780 = vst.msk [vmem:[%s3882_s19 + $0x78] sm:$0xff] %vm933_vm1, %v2764_v56  ;;  %v2763_v61 = vadd.f32 %v4560_v26, %v2735_v11 }
 0x770   : > { %2779 = vst.msk [vmem:[%s3882_s19 + $0x70] sm:$0xff] %vm933_vm1, %v2763_v61 }
 0x771 PF: > { %s20_s17 = sadd.s32 1, %s3780_s17   ;;  %s4637_s29 = sld [smem:[#allocation4_spill]] }
 0x772   : > { %p17_p8 = scmp.ge.s32.totalorder %s20_s17, 6   ;;  %s4638_s13 = smov %s3772_s15 }
 0x773   : > { %s4639_s14 = smov %s3776_s16  ;;  %s4640_s15 = smov %s4643_s18 }
 0x774   :  { %19 = sbr.rel (!%p17_p8) target bundleno = 3 (0x3), region = 97 }
 0x777   : > { %s4641_s16 = smov %s4637_s29 }

</bundles_post_ra>
